<compile_context>
chip_gen: v5e
topology: v5e:2x2
jax: 0.10.0
libtpu: 0.0.40
codegen_flags: <defaults>
</compile_context>

<pallas_src>
import functools
import warnings

import jax
import jax.numpy as jnp
from jax.experimental import pallas as pl
from jax.experimental.pallas import tpu as pltpu

LN_EPS = 1e-5
BN_EPS = 1e-5
_HIGHEST = jax.lax.Precision.HIGHEST


# ------------------------------ small helpers ------------------------------ #
def _round_up(x: int, m: int) -> int:
    return ((x + m - 1) // m) * m


def _block_diag(m: jnp.ndarray, p: int) -> jnp.ndarray:
    """(a, b) -> (p*a, p*b) block-diagonal with p copies of m."""
    if p == 1:
        return m
    a, b = m.shape
    eye = jnp.eye(p, dtype=m.dtype)
    return (eye[:, None, :, None] * m[None, :, None, :]).reshape(p * a, p * b)


def _fold_bn(w, b, gamma, beta, mean, var):
    """Fold eval-mode BatchNorm (arbitrary running stats) into Linear(w, b)."""
    s = gamma / jnp.sqrt(var + BN_EPS)
    return w * s[None, :], (b - mean) * s + beta


def _num_tensorcores() -> int:
    """Best-effort TensorCores-per-chip (v7x: 2; v5e/v6e: 1)."""
    try:
        info = pltpu.get_tpu_info()
    except Exception:
        return 1
    for name in ("num_tensorcores", "tensorcores_per_chip", "num_cores",
                 "core_count", "cores_per_chip"):
        v = getattr(info, name, None)
        if isinstance(v, int) and 1 <= v <= 8:
            return v
    return 1


# ------------------------------ Pallas kernel ------------------------------ #
def _guidance_kernel(q_ref, k_ref, *rest, layer_norm: bool, inv_c: float,
                     scale_stats: bool):
    if layer_norm:
        (seg_ref, gq_ref, gk_ref,
         w1_ref, b1_ref, w2_ref, b2_ref, out_ref) = rest
    else:
        w1_ref, b1_ref, w2_ref, b2_ref, out_ref = rest

    f32 = jnp.float32
    bf16 = jnp.bfloat16
    q = q_ref[...].astype(f32)                       # (tm, L) lane-dense packed
    k = k_ref[...].astype(f32)

    if layer_norm:
        seg = seg_ref[...]                           # (L, L) bf16 block-diag

        def seg_mean(x):
            # Per-segment mean, broadcast back to every lane of the segment,
            # on the MXU.  The f32 LHS is split into a 2-term bf16 hi/lo pair
            # (2 native bf16 passes; ~2^-18 relative error, far below the 2e-5
            # parity budget).  The segment matrix is exactly representable in
            # bf16 when C is a power of two (always true on the packed path).
            hi = x.astype(bf16)
            lo = (x - hi.astype(f32)).astype(bf16)
            m = jnp.dot(hi, seg, preferred_element_type=f32)
            m = m + jnp.dot(lo, seg, preferred_element_type=f32)
            if scale_stats:                          # only when 1/C not exact
                m = m * inv_c
            return m

        def ln_core(x, g):
            mu = seg_mean(x)
            d = x - mu
            # Two-pass variance (no E[x^2]-mu^2 cancellation) + clamp.
            var = jnp.maximum(seg_mean(d * d), 0.0)
            inv = jax.lax.rsqrt(var + LN_EPS)        # EUP
            # gamma fused into a single scale; beta folded into b1 (wrapper).
            return d * (inv * g)

        s = ln_core(q, gq_ref[...]) - ln_core(k, gk_ref[...])
    else:
        s = q - k

    h = jnp.dot(s, w1_ref[...], preferred_element_type=f32,
                precision=_HIGHEST) + b1_ref[...]
    h = jnp.maximum(h, 0.0)                          # ReLU
    o = jnp.dot(h, w2_ref[...], preferred_element_type=f32,
                precision=_HIGHEST) + b2_ref[...]
    # sigmoid(o) = 1 / (1 + exp(-o)): exp on the EUP; full-precision reciprocal
    # (pl.reciprocal(approx=True) would be free on the EUP but its ~1e-3 error
    # breaks the 2e-5 parity requirement).
    e = jnp.exp(-o)
    out_ref[...] = pl.reciprocal(1.0 + e).astype(out_ref.dtype)


# -------------------------------- wrapper ----------------------------------- #
def multi_head_guidance(q, k, params, *, batch_norm: bool,
                        layer_norm_guidance: bool,
                        tile_packed_rows: int = 1024):
    """q, k: (B, N, K, C) float32 or bfloat16.  Returns (B, N, K, num_heads)."""
    B, N, K, C = q.shape
    M = B * N * K

    w1 = params["w1"].astype(jnp.float32)            # (C, HID)
    b1 = params["b1"].astype(jnp.float32)            # (HID,)
    w2 = params["w2"].astype(jnp.float32)            # (HID, H)
    b2 = params["b2"].astype(jnp.float32)            # (H,)
    HID = w1.shape[1]
    H = w2.shape[1]

    if batch_norm:
        w1, b1 = _fold_bn(w1, b1, params["bn1_gamma"], params["bn1_beta"],
                          params.get("bn1_mean", jnp.zeros_like(b1)),
                          params.get("bn1_var", jnp.ones_like(b1)))
        w2, b2 = _fold_bn(w2, b2, params["bn2_gamma"], params["bn2_beta"],
                          params.get("bn2_mean", jnp.zeros_like(b2)),
                          params.get("bn2_var", jnp.ones_like(b2)))

    if layer_norm_guidance:
        # Fold the LayerNorm shift into the first Linear bias:
        #   (lnq + beta_q - lnk - beta_k) @ W1 + b1
        #     = (lnq' - lnk') @ W1 + [b1 + (beta_q - beta_k) @ W1]
        b_q = params["ln_q_beta"].astype(jnp.float32)
        b_k = params["ln_k_beta"].astype(jnp.float32)
        b1 = b1 + (b_q - b_k) @ w1

    # ---- row packing factor: P original rows per 128-lane vreg row ---------
    if C <= 128 and 128 % C == 0:
        P = 128 // C
    else:
        P = 1                                        # lane-sparse fallback
        warnings.warn(
            "MultiHeadGuidance Pallas kernel: num_hiddens=%d does not divide "
            "128; using the lane-sparse P=1 fallback (correct but slow)." % C)
    L = P * C

    M_pack = _round_up(M, P)                         # tiny pad to multiple of P
    Mp = M_pack // P                                 # packed rows

    # ---- tile / grid sizing ------------------------------------------------
    # Only multi-TensorCore parts (v7x) get a core-balanced grid split; on
    # single-TC v5e/v6e the largest tile is used directly (no per-step tax).
    ncores = _num_tensorcores()
    if ncores > 1:
        nt = ncores * pl.cdiv(Mp, ncores * tile_packed_rows)
    else:
        nt = pl.cdiv(Mp, tile_packed_rows)
    nt = max(nt, 1)
    if nt == 1:
        tm = Mp                                      # full-extent block
    else:
        tm = _round_up(pl.cdiv(Mp, nt), 8)
        nt = pl.cdiv(Mp, tm)                         # ragged tail handled by Pallas

    def pack(x):
        x2 = x.reshape(M, C)
        if M_pack != M:
            # TODO(synk): this pad materialises a copy; it only triggers when
            # B*N*K is not a multiple of P (rare in practice).
            x2 = jnp.pad(x2, ((0, M_pack - M), (0, 0)))
        return x2.reshape(Mp, L)          # free: channels-last rows contiguous

    qp, kp = pack(q), pack(k)

    # ---- block-diagonally expanded parameters -------------------------------
    w1p = _block_diag(w1, P)                         # (L, P*HID)
    b1p = jnp.tile(b1, P).reshape(1, P * HID)
    w2p = _block_diag(w2, P)                         # (P*HID, P*H)
    b2p = jnp.tile(b2, P).reshape(1, P * H)

    def const(shape):
        return pl.BlockSpec(shape, lambda i: (0, 0))

    c_pow2 = (C & (C - 1)) == 0                      # 1/C exact in bf16?
    if layer_norm_guidance:
        fill = (1.0 / C) if c_pow2 else 1.0
        seg = _block_diag(jnp.full((C, C), fill, jnp.float32), P)
        seg = seg.astype(jnp.bfloat16)               # exact for power-of-two C
        gq = jnp.tile(params["ln_q_gamma"].astype(jnp.float32), P).reshape(1, L)
        gk = jnp.tile(params["ln_k_gamma"].astype(jnp.float32), P).reshape(1, L)
        ln_args = (seg, gq, gk)
        ln_specs = [const((L, L)), const((1, L)), const((1, L))]
    else:
        ln_args = ()
        ln_specs = []

    kernel = functools.partial(_guidance_kernel,
                               layer_norm=layer_norm_guidance,
                               inv_c=1.0 / C,
                               scale_stats=not c_pow2)

    out = pl.pallas_call(
        kernel,
        out_shape=jax.ShapeDtypeStruct((Mp, P * H), jnp.float32),
        grid=(nt,),
        in_specs=[
            pl.BlockSpec((tm, L), lambda i: (i, 0)),          # q rows (packed)
            pl.BlockSpec((tm, L), lambda i: (i, 0)),          # k rows (packed)
            *ln_specs,                                        # seg + gammas
            const((L, P * HID)), const((1, P * HID)),         # W1 (folded), b1
            const((P * HID, P * H)), const((1, P * H)),       # W2 (folded), b2
        ],
        out_specs=pl.BlockSpec((tm, P * H), lambda i: (i, 0)),
        compiler_params=pltpu.CompilerParams(
            dimension_semantics=("parallel",),
            vmem_limit_bytes=32 * 1024 * 1024),
    )(qp, kp, *ln_args, w1p, b1p, w2p, b2p)

    out = out.reshape(M_pack, H)                     # free metadata reshape
    if M_pack != M:
        out = out[:M]                                # drop padded rows
    return out.reshape(B, N, K, H)


# ---------------------------- pure-JAX reference ----------------------------- #
def reference(q, k, params, *, batch_norm: bool, layer_norm_guidance: bool):
    def ln(x, g, b):
        mu = jnp.mean(x, axis=-1, keepdims=True)
        var = jnp.mean((x - mu) ** 2, axis=-1, keepdims=True)
        return (x - mu) / jnp.sqrt(var + LN_EPS) * g + b

    if layer_norm_guidance:
        scores = ln(q, params["ln_q_gamma"], params["ln_q_beta"]) - \
                 ln(k, params["ln_k_gamma"], params["ln_k_beta"])
    else:
        scores = q - k

    def bn_eval(x, gamma, beta, mean, var):
        return (x - mean) / jnp.sqrt(var + BN_EPS) * gamma + beta

    x = jnp.dot(scores, params["w1"], precision=_HIGHEST) + params["b1"]
    if batch_norm:
        x = bn_eval(x, params["bn1_gamma"], params["bn1_beta"],
                    params.get("bn1_mean", 0.0), params.get("bn1_var", 1.0))
    x = jnp.maximum(x, 0.0)
    x = jnp.dot(x, params["w2"], precision=_HIGHEST) + params["b2"]
    if batch_norm:
        x = bn_eval(x, params["bn2_gamma"], params["bn2_beta"],
                    params.get("bn2_mean", 0.0), params.get("bn2_var", 1.0))
    return jax.nn.sigmoid(x)


# ---------------------------------- main ------------------------------------ #
if __name__ == "__main__":
    C = 32                        # num_hiddens
    H = 4                         # num_heads
    HID = 8                       # fixed by mlp_dim = [num_hiddens, 8, num_heads]

    key = jax.random.PRNGKey(0)
    keys = jax.random.split(key, 20)

    params = {
        # LayerNorm(num_hiddens) for q and k
        "ln_q_gamma": 1.0 + 0.1 * jax.random.normal(keys[2], (C,), jnp.float32),
        "ln_q_beta": 0.1 * jax.random.normal(keys[3], (C,), jnp.float32),
        "ln_k_gamma": 1.0 + 0.1 * jax.random.normal(keys[4], (C,), jnp.float32),
        "ln_k_beta": 0.1 * jax.random.normal(keys[5], (C,), jnp.float32),
        # Linear(C -> 8) and Linear(8 -> H), stored as (in, out)
        "w1": jax.random.normal(keys[6], (C, HID), jnp.float32) / jnp.sqrt(C),
        "b1": 0.1 * jax.random.normal(keys[7], (HID,), jnp.float32),
        "w2": jax.random.normal(keys[8], (HID, H), jnp.float32) / jnp.sqrt(HID),
        "b2": 0.1 * jax.random.normal(keys[9], (H,), jnp.float32),
        # BatchNorm2d affine params + non-trivial running stats (eval mode)
        "bn1_gamma": 1.0 + 0.1 * jax.random.normal(keys[10], (HID,), jnp.float32),
        "bn1_beta": 0.1 * jax.random.normal(keys[11], (HID,), jnp.float32),
        "bn1_mean": 0.2 * jax.random.normal(keys[12], (HID,), jnp.float32),
        "bn1_var": 0.5 + jax.random.uniform(keys[13], (HID,), jnp.float32),
        "bn2_gamma": 1.0 + 0.1 * jax.random.normal(keys[14], (H,), jnp.float32),
        "bn2_beta": 0.1 * jax.random.normal(keys[15], (H,), jnp.float32),
        "bn2_mean": 0.2 * jax.random.normal(keys[16], (H,), jnp.float32),
        "bn2_var": 0.5 + jax.random.uniform(keys[17], (H,), jnp.float32),
    }

    ok = True
    # shape 1: tiny; shape 2: M % P != 0 (pad path); shape 3: full-size tile;
    # shape 4: multi-tile grid with a ragged last block.
    test_cases = [
        ((2, 16, 8),   [(True, True), (False, False), (False, True)]),
        ((1, 13, 7),   [(True, True), (False, False), (False, True)]),
        ((2, 128, 32), [(True, True)]),
        ((1, 257, 20), [(True, True)]),
    ]
    for (B, N, K), combos in test_cases:
        kq = jax.random.fold_in(keys[0], B * N * K)
        kk = jax.random.fold_in(keys[1], B * N * K)
        q = jax.random.normal(kq, (B, N, K, C), jnp.float32)
        k = jax.random.normal(kk, (B, N, K, C), jnp.float32)
        for bn_flag, ln_flag in combos:
            out = multi_head_guidance(q, k, params, batch_norm=bn_flag,
                                      layer_norm_guidance=ln_flag)
            out = jax.block_until_ready(out)
            ref = reference(q, k, params, batch_norm=bn_flag,
                            layer_norm_guidance=ln_flag)
            ok &= bool(jnp.allclose(out, ref, atol=2e-5, rtol=2e-5))
            assert out.shape == (B, N, K, H)

    print("KERNEL_OK" if ok else "KERNEL_MISMATCH")
</pallas_src>

<mosaic_0001>
module attributes {stable_mosaic.version = 11 : i64} {
  func.func @_guidance_kernel(%arg0: i32, %arg1: memref<64x128xf32, #tpu.memory_space<vmem>>, %arg2: memref<64x128xf32, #tpu.memory_space<vmem>>, %arg3: memref<128x128xbf16, #tpu.memory_space<vmem>>, %arg4: memref<1x128xf32, #tpu.memory_space<vmem>>, %arg5: memref<1x128xf32, #tpu.memory_space<vmem>>, %arg6: memref<128x32xf32, #tpu.memory_space<vmem>>, %arg7: memref<1x32xf32, #tpu.memory_space<vmem>>, %arg8: memref<32x16xf32, #tpu.memory_space<vmem>>, %arg9: memref<1x16xf32, #tpu.memory_space<vmem>>, %arg10: memref<64x16xf32, #tpu.memory_space<vmem>>) attributes {dimension_semantics = [#tpu.dimension_semantics<parallel>], iteration_bounds = array<i64: 1>, scalar_prefetch = 0 : i64, scratch_operands = 0 : i64, tpu.core_type = #tpu.core_type<tc>, window_params = [{transform_indices = @transform_0, window_bounds = array<i64: 64, 128>}, {transform_indices = @transform_1, window_bounds = array<i64: 64, 128>}, {pipeline_mode = #tpu.pipeline_mode<synchronous>, transform_indices = @transform_2, window_bounds = array<i64: 128, 128>}, {pipeline_mode = #tpu.pipeline_mode<synchronous>, transform_indices = @transform_3, window_bounds = array<i64: 1, 128>}, {pipeline_mode = #tpu.pipeline_mode<synchronous>, transform_indices = @transform_4, window_bounds = array<i64: 1, 128>}, {pipeline_mode = #tpu.pipeline_mode<synchronous>, transform_indices = @transform_5, window_bounds = array<i64: 128, 32>}, {pipeline_mode = #tpu.pipeline_mode<synchronous>, transform_indices = @transform_6, window_bounds = array<i64: 1, 32>}, {pipeline_mode = #tpu.pipeline_mode<synchronous>, transform_indices = @transform_7, window_bounds = array<i64: 32, 16>}, {pipeline_mode = #tpu.pipeline_mode<synchronous>, transform_indices = @transform_8, window_bounds = array<i64: 1, 16>}, {transform_indices = @transform_9, window_bounds = array<i64: 64, 16>}]} {
    %c0 = arith.constant 0 : index
    %c0_0 = arith.constant 0 : index
    %0 = vector.load %arg1[%c0, %c0_0] : memref<64x128xf32, #tpu.memory_space<vmem>>, vector<64x128xf32>
    %c0_1 = arith.constant 0 : index
    %c0_2 = arith.constant 0 : index
    %1 = vector.load %arg2[%c0_1, %c0_2] : memref<64x128xf32, #tpu.memory_space<vmem>>, vector<64x128xf32>
    %c0_3 = arith.constant 0 : index
    %c0_4 = arith.constant 0 : index
    %2 = vector.load %arg3[%c0_3, %c0_4] : memref<128x128xbf16, #tpu.memory_space<vmem>>, vector<128x128xbf16>
    %c0_5 = arith.constant 0 : index
    %c0_6 = arith.constant 0 : index
    %3 = vector.load %arg4[%c0_5, %c0_6] : memref<1x128xf32, #tpu.memory_space<vmem>>, vector<1x128xf32>
    %4 = arith.truncf %0 : vector<64x128xf32> to vector<64x128xbf16>
    %5 = arith.extf %4 : vector<64x128xbf16> to vector<64x128xf32>
    %6 = arith.subf %0, %5 : vector<64x128xf32>
    %7 = arith.truncf %6 : vector<64x128xf32> to vector<64x128xbf16>
    %cst = arith.constant dense<0.000000e+00> : vector<64x128xf32>
    %8 = tpu.matmul %4, %2, %cst {dimension_numbers = #tpu.dot_dimension_numbers<[1], [0], [0], [1], [0, 0, 1, 1], [], []>} : vector<64x128xbf16>, vector<128x128xbf16>, vector<64x128xf32> -> vector<64x128xf32>
    %cst_7 = arith.constant dense<0.000000e+00> : vector<64x128xf32>
    %9 = tpu.matmul %7, %2, %cst_7 {dimension_numbers = #tpu.dot_dimension_numbers<[1], [0], [0], [1], [0, 0, 1, 1], [], []>} : vector<64x128xbf16>, vector<128x128xbf16>, vector<64x128xf32> -> vector<64x128xf32>
    %10 = arith.addf %8, %9 : vector<64x128xf32>
    %11 = arith.subf %0, %10 : vector<64x128xf32>
    %12 = arith.mulf %11, %11 : vector<64x128xf32>
    %13 = arith.truncf %12 : vector<64x128xf32> to vector<64x128xbf16>
    %14 = arith.extf %13 : vector<64x128xbf16> to vector<64x128xf32>
    %15 = arith.subf %12, %14 : vector<64x128xf32>
    %16 = arith.truncf %15 : vector<64x128xf32> to vector<64x128xbf16>
    %cst_8 = arith.constant dense<0.000000e+00> : vector<64x128xf32>
    %17 = tpu.matmul %13, %2, %cst_8 {dimension_numbers = #tpu.dot_dimension_numbers<[1], [0], [0], [1], [0, 0, 1, 1], [], []>} : vector<64x128xbf16>, vector<128x128xbf16>, vector<64x128xf32> -> vector<64x128xf32>
    %cst_9 = arith.constant dense<0.000000e+00> : vector<64x128xf32>
    %18 = tpu.matmul %16, %2, %cst_9 {dimension_numbers = #tpu.dot_dimension_numbers<[1], [0], [0], [1], [0, 0, 1, 1], [], []>} : vector<64x128xbf16>, vector<128x128xbf16>, vector<64x128xf32> -> vector<64x128xf32>
    %19 = arith.addf %17, %18 : vector<64x128xf32>
    %cst_10 = arith.constant 0.000000e+00 : f32
    %20 = vector.broadcast %cst_10 : f32 to vector<64x128xf32>
    %21 = arith.maximumf %19, %20 : vector<64x128xf32>
    %cst_11 = arith.constant 9.99999974E-6 : f32
    %22 = vector.broadcast %cst_11 : f32 to vector<64x128xf32>
    %23 = arith.addf %21, %22 : vector<64x128xf32>
    %24 = math.rsqrt %23 : vector<64x128xf32>
    %25 = vector.broadcast %3 : vector<1x128xf32> to vector<64x128xf32>
    %26 = arith.mulf %24, %25 : vector<64x128xf32>
    %27 = arith.mulf %11, %26 : vector<64x128xf32>
    %c0_12 = arith.constant 0 : index
    %c0_13 = arith.constant 0 : index
    %28 = vector.load %arg5[%c0_12, %c0_13] : memref<1x128xf32, #tpu.memory_space<vmem>>, vector<1x128xf32>
    %29 = arith.truncf %1 : vector<64x128xf32> to vector<64x128xbf16>
    %30 = arith.extf %29 : vector<64x128xbf16> to vector<64x128xf32>
    %31 = arith.subf %1, %30 : vector<64x128xf32>
    %32 = arith.truncf %31 : vector<64x128xf32> to vector<64x128xbf16>
    %cst_14 = arith.constant dense<0.000000e+00> : vector<64x128xf32>
    %33 = tpu.matmul %29, %2, %cst_14 {dimension_numbers = #tpu.dot_dimension_numbers<[1], [0], [0], [1], [0, 0, 1, 1], [], []>} : vector<64x128xbf16>, vector<128x128xbf16>, vector<64x128xf32> -> vector<64x128xf32>
    %cst_15 = arith.constant dense<0.000000e+00> : vector<64x128xf32>
    %34 = tpu.matmul %32, %2, %cst_15 {dimension_numbers = #tpu.dot_dimension_numbers<[1], [0], [0], [1], [0, 0, 1, 1], [], []>} : vector<64x128xbf16>, vector<128x128xbf16>, vector<64x128xf32> -> vector<64x128xf32>
    %35 = arith.addf %33, %34 : vector<64x128xf32>
    %36 = arith.subf %1, %35 : vector<64x128xf32>
    %37 = arith.mulf %36, %36 : vector<64x128xf32>
    %38 = arith.truncf %37 : vector<64x128xf32> to vector<64x128xbf16>
    %39 = arith.extf %38 : vector<64x128xbf16> to vector<64x128xf32>
    %40 = arith.subf %37, %39 : vector<64x128xf32>
    %41 = arith.truncf %40 : vector<64x128xf32> to vector<64x128xbf16>
    %cst_16 = arith.constant dense<0.000000e+00> : vector<64x128xf32>
    %42 = tpu.matmul %38, %2, %cst_16 {dimension_numbers = #tpu.dot_dimension_numbers<[1], [0], [0], [1], [0, 0, 1, 1], [], []>} : vector<64x128xbf16>, vector<128x128xbf16>, vector<64x128xf32> -> vector<64x128xf32>
    %cst_17 = arith.constant dense<0.000000e+00> : vector<64x128xf32>
    %43 = tpu.matmul %41, %2, %cst_17 {dimension_numbers = #tpu.dot_dimension_numbers<[1], [0], [0], [1], [0, 0, 1, 1], [], []>} : vector<64x128xbf16>, vector<128x128xbf16>, vector<64x128xf32> -> vector<64x128xf32>
    %44 = arith.addf %42, %43 : vector<64x128xf32>
    %cst_18 = arith.constant 0.000000e+00 : f32
    %45 = vector.broadcast %cst_18 : f32 to vector<64x128xf32>
    %46 = arith.maximumf %44, %45 : vector<64x128xf32>
    %cst_19 = arith.constant 9.99999974E-6 : f32
    %47 = vector.broadcast %cst_19 : f32 to vector<64x128xf32>
    %48 = arith.addf %46, %47 : vector<64x128xf32>
    %49 = math.rsqrt %48 : vector<64x128xf32>
    %50 = vector.broadcast %28 : vector<1x128xf32> to vector<64x128xf32>
    %51 = arith.mulf %49, %50 : vector<64x128xf32>
    %52 = arith.mulf %36, %51 : vector<64x128xf32>
    %53 = arith.subf %27, %52 : vector<64x128xf32>
    %c0_20 = arith.constant 0 : index
    %c0_21 = arith.constant 0 : index
    %54 = vector.load %arg6[%c0_20, %c0_21] : memref<128x32xf32, #tpu.memory_space<vmem>>, vector<128x32xf32>
    %cst_22 = arith.constant dense<0.000000e+00> : vector<64x32xf32>
    %55 = tpu.matmul %53, %54, %cst_22 {dimension_numbers = #tpu.dot_dimension_numbers<[1], [0], [0], [1], [0, 0, 1, 1], [], []>, precision = #tpu.contract_precision<fp32>} : vector<64x128xf32>, vector<128x32xf32>, vector<64x32xf32> -> vector<64x32xf32>
    %c0_23 = arith.constant 0 : index
    %c0_24 = arith.constant 0 : index
    %56 = vector.load %arg7[%c0_23, %c0_24] : memref<1x32xf32, #tpu.memory_space<vmem>>, vector<1x32xf32>
    %57 = vector.broadcast %56 : vector<1x32xf32> to vector<64x32xf32>
    %58 = arith.addf %55, %57 : vector<64x32xf32>
    %cst_25 = arith.constant 0.000000e+00 : f32
    %59 = vector.broadcast %cst_25 : f32 to vector<64x32xf32>
    %60 = arith.maximumf %58, %59 : vector<64x32xf32>
    %c0_26 = arith.constant 0 : index
    %c0_27 = arith.constant 0 : index
    %61 = vector.load %arg8[%c0_26, %c0_27] : memref<32x16xf32, #tpu.memory_space<vmem>>, vector<32x16xf32>
    %cst_28 = arith.constant dense<0.000000e+00> : vector<64x16xf32>
    %62 = tpu.matmul %60, %61, %cst_28 {dimension_numbers = #tpu.dot_dimension_numbers<[1], [0], [0], [1], [0, 0, 1, 1], [], []>, precision = #tpu.contract_precision<fp32>} : vector<64x32xf32>, vector<32x16xf32>, vector<64x16xf32> -> vector<64x16xf32>
    %c0_29 = arith.constant 0 : index
    %c0_30 = arith.constant 0 : index
    %63 = vector.load %arg9[%c0_29, %c0_30] : memref<1x16xf32, #tpu.memory_space<vmem>>, vector<1x16xf32>
    %64 = vector.broadcast %63 : vector<1x16xf32> to vector<64x16xf32>
    %65 = arith.addf %62, %64 : vector<64x16xf32>
    %cst_31 = arith.constant 0.000000e+00 : f32
    %66 = vector.broadcast %cst_31 : f32 to vector<64x16xf32>
    %67 = arith.subf %66, %65 : vector<64x16xf32>
    %68 = math.exp %67 : vector<64x16xf32>
    %cst_32 = arith.constant 1.000000e+00 : f32
    %69 = vector.broadcast %cst_32 : f32 to vector<64x16xf32>
    %70 = arith.addf %69, %68 : vector<64x16xf32>
    %71 = tpu.reciprocal %70 : vector<64x16xf32> -> vector<64x16xf32>
    %c0_33 = arith.constant 0 : index
    %c0_34 = arith.constant 0 : index
    %72 = vector.load %arg10[%c0_33, %c0_34] : memref<64x16xf32, #tpu.memory_space<vmem>>, vector<64x16xf32>
    tpu.vector_store %arg10[%c0_33, %c0_34], %71 {strides = array<i32>} : memref<64x16xf32, #tpu.memory_space<vmem>>, vector<64x16xf32>,
    return
  }
  func.func @transform_0(%arg0: i32) -> (i32, i32) {
    %c0_i32 = arith.constant 0 : i32
    %c0_i32_0 = arith.constant 0 : i32
    return %arg0, %c0_i32 : i32, i32
  }
  func.func @transform_1(%arg0: i32) -> (i32, i32) {
    %c0_i32 = arith.constant 0 : i32
    %c0_i32_0 = arith.constant 0 : i32
    return %arg0, %c0_i32 : i32, i32
  }
  func.func @transform_2(%arg0: i32) -> (i32, i32) {
    %c0_i32 = arith.constant 0 : i32
    %c0_i32_0 = arith.constant 0 : i32
    %c0_i32_1 = arith.constant 0 : i32
    return %c0_i32, %c0_i32_0 : i32, i32
  }
  func.func @transform_3(%arg0: i32) -> (i32, i32) {
    %c0_i32 = arith.constant 0 : i32
    %c0_i32_0 = arith.constant 0 : i32
    %c0_i32_1 = arith.constant 0 : i32
    return %c0_i32, %c0_i32_0 : i32, i32
  }
  func.func @transform_4(%arg0: i32) -> (i32, i32) {
    %c0_i32 = arith.constant 0 : i32
    %c0_i32_0 = arith.constant 0 : i32
    %c0_i32_1 = arith.constant 0 : i32
    return %c0_i32, %c0_i32_0 : i32, i32
  }
  func.func @transform_5(%arg0: i32) -> (i32, i32) {
    %c0_i32 = arith.constant 0 : i32
    %c0_i32_0 = arith.constant 0 : i32
    %c0_i32_1 = arith.constant 0 : i32
    return %c0_i32, %c0_i32_0 : i32, i32
  }
  func.func @transform_6(%arg0: i32) -> (i32, i32) {
    %c0_i32 = arith.constant 0 : i32
    %c0_i32_0 = arith.constant 0 : i32
    %c0_i32_1 = arith.constant 0 : i32
    return %c0_i32, %c0_i32_0 : i32, i32
  }
  func.func @transform_7(%arg0: i32) -> (i32, i32) {
    %c0_i32 = arith.constant 0 : i32
    %c0_i32_0 = arith.constant 0 : i32
    %c0_i32_1 = arith.constant 0 : i32
    return %c0_i32, %c0_i32_0 : i32, i32
  }
  func.func @transform_8(%arg0: i32) -> (i32, i32) {
    %c0_i32 = arith.constant 0 : i32
    %c0_i32_0 = arith.constant 0 : i32
    %c0_i32_1 = arith.constant 0 : i32
    return %c0_i32, %c0_i32_0 : i32, i32
  }
  func.func @transform_9(%arg0: i32) -> (i32, i32) {
    %c0_i32 = arith.constant 0 : i32
    %c0_i32_0 = arith.constant 0 : i32
    return %arg0, %c0_i32 : i32, i32
  }
}

</mosaic_0001>

<bundles_post_ra>
// kernel: tpu_custom_call.1
= control target key start
LH: loop header
LB: loop body
LE: loop exit
PB: predicated region body
PF: predicated region fallthrough
CT: control target
= control target key end

     0   :  { %14 = vsyncpa [#allocation3], 0  ;;  %s2156_s12 = smov [#allocation2]   ;;  %s2157_s14 = smov 64   ;;  %s3298_s0 = inlined_call_operand.vmem [shape: f32[64,128], index: 0, kind: input, shape index: {}]   ;;  %s3299_s1 = inlined_call_operand.vmem [shape: f32[64,128], index: 1, kind: input, shape index: {}]   ;;  %s3300_s2 = inlined_call_operand.hbm [shape: bf16[128,128], index: 2, kind: input, shape index: {}]   ;;  %s3301_s3 = inlined_call_operand.vmem [shape: f32[1,128], index: 3, kind: input, shape index: {}]   ;;  %s3302_s4 = inlined_call_operand.vmem [shape: f32[1,128], index: 4, kind: input, shape index: {}]   ;;  %s3303_s5 = inlined_call_operand.vmem [shape: f32[128,32], index: 5, kind: input, shape index: {}]   ;;  %s3304_s6 = inlined_call_operand.vmem [shape: f32[1,32], index: 6, kind: input, shape index: {}]   ;;  %s3305_s7 = inlined_call_operand.vmem [shape: f32[32,16], index: 7, kind: input, shape index: {}]   ;;  %s3306_s8 = inlined_call_operand.vmem [shape: f32[1,16], index: 8, kind: input, shape index: {}]   ;;  %s3307_s9 = inlined_call_operand.vmem [shape: f32[64,16], index: 9, kind: output, shape index: {}]  }
   0x1   :  { %s23_s11 = sshll.u32 %s3300_s2, 4  ;;  %s25_s13 = sshll.u32 %s2156_s12, 4  ;;  %s24_s11 = int_to_ptr.hbm [resolvable:$true] %s23_s11  ;;  %s26_s13 = int_to_ptr.vmem [resolvable:$true] %s25_s13 }
   0x2   :  { %s2158_s15 = smov 4  }
   0x3   :  { %31 = dma.hbm_to_vmem [thread:$0]  %s24_s11, 1024, %s26_s13, [#allocation3], %s2157_s14, %s2157_s14, %s2158_s15  }
   0x4   :  { %2154 = dma.done.wait [#allocation3], 1024  }
   0x5   :  { %2155 = vsyncadd [#allocation3], 4294966272  ;;  %v2058_v0 = vld [vmem:[#allocation2 + $0x38] sm:$0xff]  ;;  %v2212_v1 = vld [vmem:[#allocation2 + $0x30] sm:$0xff] }
   0x6   :  { %157 = vmatpush.bf16.msra.mxu0 %v2058_v0  ;;  %210 = vmatpush.bf16.msra.mxu1 %v2058_v0  ;;  %v2216_v2 = vld [vmem:[#allocation2 + $0x28] sm:$0xff]  ;;  %v2222_v3 = vld [vmem:[#allocation2 + $0x20] sm:$0xff]  ;;  %v2228_v4 = vld [vmem:[#allocation2 + $0x18] sm:$0xff] }
   0x7   :  { %336 = vmatpush.bf16.msra.mxu3 %v2058_v0  ;;  %283 = vmatpush.bf16.msra.mxu2 %v2058_v0  ;;  %v2233_v5 = vld [vmem:[%s3298_s0] sm:$0xff]  ;;  %v2238_v6 = vld [vmem:[%s3298_s0 + $0x8] sm:$0xff]  ;;  %v2248_v9 = vld [vmem:[#allocation2 + $0x10] sm:$0xff] }
   0x8   :  { %v81_v7 = vpack.c.bf16 %v2233_v5, %v2233_v5  ;;  %v82_v8 = vpack.c.bf16 %v2238_v6, %v2238_v6  ;;  %v2254_v12 = vld [vmem:[#allocation2 + $0x8] sm:$0xff]  ;;  %v2262_v17 = vld [vmem:[#allocation2] sm:$0xff]  ;;  %v2271_v20 = vld [vmem:[%s3298_s0 + $0x10] sm:$0xff] }
   0x9   :  { %v2276_v21 = vld [vmem:[%s3298_s0 + $0x18] sm:$0xff]  ;;  %v83_v22 = vpack.c.bf16 %v2271_v20, %v2271_v20  ;;  %v2299_v32 = vld [vmem:[%s3298_s0 + $0x20] sm:$0xff]  ;;  %v2304_v33 = vld [vmem:[%s3298_s0 + $0x28] sm:$0xff] }
   0xa   :  { %158 = vmatpush.bf16.msra.mxu0 %v2212_v1  ;;  %211 = vmatpush.bf16.msra.mxu1 %v2212_v1  ;;  %v89_v10 = vunpack.c.l.bf16 %v81_v7  ;;  %v90_v11 = vunpack.c.l.bf16 %v82_v8  ;;  %v194_v15 = vunpack.c.l.b16 %v81_v7  ;;  %v195_v16 = vunpack.c.l.b16 %v82_v8  ;;  %v2331_v44 = vld [vmem:[%s3298_s0 + $0x30] sm:$0xff]  ;;  %v2336_v45 = vld [vmem:[%s3298_s0 + $0x38] sm:$0xff]  ;;  %v2349_v56 = vld [vmem:[%s3299_s1] sm:$0xff] }
   0xb   :  { %337 = vmatpush.bf16.msra.mxu3 %v2212_v1  ;;  %284 = vmatpush.bf16.msra.mxu2 %v2212_v1  ;;  %v84_v23 = vpack.c.bf16 %v2276_v21, %v2276_v21  ;;  %v91_v24 = vunpack.c.l.bf16 %v83_v22  ;;  %v196_v28 = vunpack.c.l.b16 %v83_v22  ;;  %v85_v34 = vpack.c.bf16 %v2299_v32, %v2299_v32  ;;  %v2354_v57 = vld [vmem:[%s3299_s1 + $0x8] sm:$0xff]  ;;  %v2370_v7 = vld [vmem:[%s3299_s1 + $0x18] sm:$0xff] }
   0xc   :  { %v97_v13 = vsub.f32 %v2233_v5, %v89_v10  ;;  %v98_v14 = vsub.f32 %v2238_v6, %v90_v11  ;;  %v202_v19 = vpack.c.b16 %v195_v16, %v194_v15  ;;  %v86_v35 = vpack.c.bf16 %v2304_v33, %v2304_v33 }
   0xd   :  { %v92_v25 = vunpack.c.l.bf16 %v84_v23  ;;  %v99_v26 = vsub.f32 %v2271_v20, %v91_v24  ;;  %v197_v29 = vunpack.c.l.b16 %v84_v23  ;;  %v93_v36 = vunpack.c.l.bf16 %v85_v34 }
   0xe   :  { %159 = vmatpush.bf16.msra.mxu0 %v2216_v2  ;;  %212 = vmatpush.bf16.msra.mxu1 %v2216_v2  ;;  %v105_v18 = vpack.c.bf16 %v98_v14, %v97_v13  ;;  %v94_v37 = vunpack.c.l.bf16 %v86_v35  ;;  %v198_v40 = vunpack.c.l.b16 %v85_v34  ;;  %v199_v41 = vunpack.c.l.b16 %v86_v35  ;;  %v2397_v34 = vld [vmem:[%s3299_s1 + $0x30] sm:$0xff]  ;;  %v2402_v35 = vld [vmem:[%s3299_s1 + $0x38] sm:$0xff] }
   0xf   :  { %338 = vmatpush.bf16.msra.mxu3 %v2216_v2  ;;  %285 = vmatpush.bf16.msra.mxu2 %v2216_v2  ;;  %v100_v27 = vsub.f32 %v2276_v21, %v92_v25  ;;  %v203_v31 = vpack.c.b16 %v197_v29, %v196_v28  ;;  %v101_v38 = vsub.f32 %v2299_v32, %v93_v36 }
  0x10   :  { %v102_v39 = vsub.f32 %v2304_v33, %v94_v37  ;;  %v204_v43 = vpack.c.b16 %v199_v41, %v198_v40  ;;  %v87_v46 = vpack.c.bf16 %v2331_v44, %v2331_v44  ;;  %v88_v47 = vpack.c.bf16 %v2336_v45, %v2336_v45 }
  0x11   :  { %v106_v30 = vpack.c.bf16 %v100_v27, %v99_v26  ;;  %v481_v58 = vpack.c.bf16 %v2349_v56, %v2349_v56  ;;  %v482_v59 = vpack.c.bf16 %v2354_v57, %v2354_v57  ;;  %v487_v36 = vpack.c.bf16 %v2397_v34, %v2397_v34 }
  0x12   :  { %160 = vmatpush.bf16.msra.mxu0 %v2222_v3  ;;  %213 = vmatpush.bf16.msra.mxu1 %v2222_v3  ;;  %v107_v42 = vpack.c.bf16 %v102_v39, %v101_v38  ;;  %v95_v48 = vunpack.c.l.bf16 %v87_v46  ;;  %v96_v49 = vunpack.c.l.bf16 %v88_v47  ;;  %v200_v52 = vunpack.c.l.b16 %v87_v46 }
  0x13   :  { %339 = vmatpush.bf16.msra.mxu3 %v2222_v3  ;;  %286 = vmatpush.bf16.msra.mxu2 %v2222_v3  ;;  %v201_v53 = vunpack.c.l.b16 %v88_v47  ;;  %v489_v60 = vunpack.c.l.bf16 %v481_v58  ;;  %v490_v61 = vunpack.c.l.bf16 %v482_v59  ;;  %v488_v37 = vpack.c.bf16 %v2402_v35, %v2402_v35 }
  0x14   :  { %v103_v50 = vsub.f32 %v2331_v44, %v95_v48  ;;  %v104_v51 = vsub.f32 %v2336_v45, %v96_v49  ;;  %v495_v38 = vunpack.c.l.bf16 %v487_v36 }
  0x15   :  { %v205_v55 = vpack.c.b16 %v201_v53, %v200_v52  ;;  %v497_v62 = vsub.f32 %v2349_v56, %v489_v60  ;;  %v498_v63 = vsub.f32 %v2354_v57, %v490_v61  ;;  %v496_v39 = vunpack.c.l.bf16 %v488_v37 }
  0x16   :  { %161 = vmatpush.bf16.msra.mxu0 %v2228_v4  ;;  %214 = vmatpush.bf16.msra.mxu1 %v2228_v4  ;;  %v108_v54 = vpack.c.bf16 %v104_v51, %v103_v50  ;;  %v503_v40 = vsub.f32 %v2397_v34, %v495_v38 }
  0x17   :  { %340 = vmatpush.bf16.msra.mxu3 %v2228_v4  ;;  %287 = vmatpush.bf16.msra.mxu2 %v2228_v4  ;;  %v504_v41 = vsub.f32 %v2402_v35, %v496_v39 }
  0x19   :  { %v508_v46 = vpack.c.bf16 %v504_v41, %v503_v40 }
  0x1a   :  { %162 = vmatpush.bf16.msra.mxu0 %v2248_v9  ;;  %215 = vmatpush.bf16.msra.mxu1 %v2248_v9 }
  0x1b   :  { %341 = vmatpush.bf16.msra.mxu3 %v2248_v9  ;;  %288 = vmatpush.bf16.msra.mxu2 %v2248_v9 }
  0x1e   :  { %163 = vmatpush.bf16.msra.mxu0 %v2254_v12  ;;  %216 = vmatpush.bf16.msra.mxu1 %v2254_v12 }
  0x1f   :  { %342 = vmatpush.bf16.msra.mxu3 %v2254_v12  ;;  %289 = vmatpush.bf16.msra.mxu2 %v2254_v12 }
  0x22   :  { %164 = vmatpush.bf16.msra.mxu0 %v2262_v17  ;;  %217 = vmatpush.bf16.msra.mxu1 %v2262_v17 }
  0x23   :  { %343 = vmatpush.bf16.msra.mxu3 %v2262_v17  ;;  %290 = vmatpush.bf16.msra.mxu2 %v2262_v17 }
  0x25   :  { %165 = vmatmul.bf16.vlgmr.msra.gmra.mxu0 %v105_v18  ;;  %218 = vmatmul.bf16.vlgmr.msra.gmra.mxu1 %v202_v19  ;;  %v2381_v18 = vld [vmem:[%s3299_s1 + $0x20] sm:$0xff]  ;;  %v2386_v19 = vld [vmem:[%s3299_s1 + $0x28] sm:$0xff] }
  0x26   :  { %509 = vmatpush.bf16.msrb.mxu0 %v2058_v0  ;;  %562 = vmatpush.bf16.msrb.mxu1 %v2058_v0  ;;  %v485_v22 = vpack.c.bf16 %v2381_v18, %v2381_v18  ;;  %v486_v23 = vpack.c.bf16 %v2386_v19, %v2386_v19 }
  0x27   :  { %635 = vmatpush.bf16.msrb.mxu2 %v2058_v0  ;;  %688 = vmatpush.bf16.msrb.mxu3 %v2058_v0  ;;  %v546_v0 = vunpack.c.l.b16 %v481_v58 }
  0x28   :  { %v493_v24 = vunpack.c.l.bf16 %v485_v22  ;;  %v494_v25 = vunpack.c.l.bf16 %v486_v23  ;;  %v550_v28 = vunpack.c.l.b16 %v485_v22  ;;  %v551_v29 = vunpack.c.l.b16 %v486_v23 }
  0x2a   :  { %510 = vmatpush.bf16.msrb.mxu0 %v2212_v1  ;;  %563 = vmatpush.bf16.msrb.mxu1 %v2212_v1  ;;  %v501_v26 = vsub.f32 %v2381_v18, %v493_v24  ;;  %v502_v27 = vsub.f32 %v2386_v19, %v494_v25 }
  0x2b   :  { %636 = vmatpush.bf16.msrb.mxu2 %v2212_v1  ;;  %689 = vmatpush.bf16.msrb.mxu3 %v2212_v1  ;;  %v547_v1 = vunpack.c.l.b16 %v482_v59 }
  0x2e   :  { %511 = vmatpush.bf16.msrb.mxu0 %v2216_v2  ;;  %564 = vmatpush.bf16.msrb.mxu1 %v2216_v2 }
  0x2f   :  { %637 = vmatpush.bf16.msrb.mxu2 %v2216_v2  ;;  %690 = vmatpush.bf16.msrb.mxu3 %v2216_v2  ;;  %v505_v2 = vpack.c.bf16 %v498_v63, %v497_v62 }
  0x32   :  { %512 = vmatpush.bf16.msrb.mxu0 %v2222_v3  ;;  %565 = vmatpush.bf16.msrb.mxu1 %v2222_v3 }
  0x33   :  { %638 = vmatpush.bf16.msrb.mxu2 %v2222_v3  ;;  %691 = vmatpush.bf16.msrb.mxu3 %v2222_v3  ;;  %v554_v3 = vpack.c.b16 %v547_v1, %v546_v0 }
  0x35   :  { %170 = vmatmul.bf16.gmra.mxu0 %v106_v30  ;;  %223 = vmatmul.bf16.gmra.mxu1 %v203_v31  ;;  %v507_v30 = vpack.c.bf16 %v502_v27, %v501_v26  ;;  %v556_v31 = vpack.c.b16 %v551_v29, %v550_v28 }
  0x36   :  { %513 = vmatpush.bf16.msrb.mxu0 %v2228_v4  ;;  %566 = vmatpush.bf16.msrb.mxu1 %v2228_v4 }
  0x37   :  { %639 = vmatpush.bf16.msrb.mxu2 %v2228_v4  ;;  %692 = vmatpush.bf16.msrb.mxu3 %v2228_v4  ;;  %v2365_v4 = vld [vmem:[%s3299_s1 + $0x10] sm:$0xff] }
  0x38   :  { %v483_v8 = vpack.c.bf16 %v2365_v4, %v2365_v4 }
  0x3a   :  { %514 = vmatpush.bf16.msrb.mxu0 %v2248_v9  ;;  %567 = vmatpush.bf16.msrb.mxu1 %v2248_v9  ;;  %v491_v10 = vunpack.c.l.bf16 %v483_v8  ;;  %v548_v14 = vunpack.c.l.b16 %v483_v8 }
  0x3b   :  { %640 = vmatpush.bf16.msrb.mxu2 %v2248_v9  ;;  %693 = vmatpush.bf16.msrb.mxu3 %v2248_v9  ;;  %v484_v9 = vpack.c.bf16 %v2370_v7, %v2370_v7 }
  0x3d   :  { %v492_v11 = vunpack.c.l.bf16 %v484_v9  ;;  %v549_v15 = vunpack.c.l.b16 %v484_v9 }
  0x3e   :  { %515 = vmatpush.bf16.msrb.mxu0 %v2254_v12  ;;  %568 = vmatpush.bf16.msrb.mxu1 %v2254_v12 }
  0x3f   :  { %641 = vmatpush.bf16.msrb.mxu2 %v2254_v12  ;;  %694 = vmatpush.bf16.msrb.mxu3 %v2254_v12  ;;  %v499_v12 = vsub.f32 %v2365_v4, %v491_v10  ;;  %v500_v13 = vsub.f32 %v2370_v7, %v492_v11 }
  0x41   :  { %v506_v16 = vpack.c.bf16 %v500_v13, %v499_v12 }
  0x42   :  { %516 = vmatpush.bf16.msrb.mxu0 %v2262_v17  ;;  %569 = vmatpush.bf16.msrb.mxu1 %v2262_v17 }
  0x43   :  { %642 = vmatpush.bf16.msrb.mxu2 %v2262_v17  ;;  %695 = vmatpush.bf16.msrb.mxu3 %v2262_v17  ;;  %v555_v17 = vpack.c.b16 %v549_v15, %v548_v14 }
  0x45   :  { %175 = vmatmul.bf16.gmra.mxu0 %v107_v42  ;;  %228 = vmatmul.bf16.gmra.mxu1 %v204_v43  ;;  %v552_v42 = vunpack.c.l.b16 %v487_v36  ;;  %v553_v43 = vunpack.c.l.b16 %v488_v37 }
  0x47   :  { %v557_v47 = vpack.c.b16 %v553_v43, %v552_v42 }
  0x55   :  { %180 = vmatmul.bf16.gmra.mxu0 %v108_v54  ;;  %233 = vmatmul.bf16.gmra.mxu1 %v205_v55 }
  0x65   :  { %517 = vmatmul.bf16.vlgmr.msrb.gmra.mxu0 %v505_v2  ;;  %570 = vmatmul.bf16.vlgmr.msrb.gmra.mxu1 %v554_v3 }
  0x75   :  { %522 = vmatmul.bf16.gmra.mxu0 %v506_v16  ;;  %575 = vmatmul.bf16.gmra.mxu1 %v555_v17 }
  0x85   :  { %527 = vmatmul.bf16.gmra.mxu0 %v507_v30  ;;  %580 = vmatmul.bf16.gmra.mxu1 %v556_v31 }
  0x95   :  { %532 = vmatmul.bf16.gmra.mxu0 %v508_v46  ;;  %585 = vmatmul.bf16.gmra.mxu1 %v557_v47 }
  0xa2   :  { %v166_v48 = vpop.f32.mrf.mxu0  ;;  %v219_v49 = vpop.f32.mrf.mxu1 }
  0xa3   :  { %v220_v50 = vadd.f32 %v219_v49, %v166_v48 }
  0xa5   :  { %v2411_v51 = vsub.f32 %v2233_v5, %v220_v50 }
  0xa7   :  { %v247_v52 = vmul.f32 %v2411_v51, %v2411_v51 }
  0xa9   :  { %v255_v59 = vpack.c.bf16 %v247_v52, %v247_v52 }
  0xaa   :  { %v168_v53 = vpop.f32.mrf.mxu0  ;;  %v221_v54 = vpop.f32.mrf.mxu1 }
  0xab   :  { %v222_v55 = vadd.f32 %v221_v54, %v168_v53  ;;  %v263_v62 = vunpack.c.l.bf16 %v255_v59  ;;  %v320_v5 = vunpack.c.l.b16 %v255_v59 }
  0xad   :  { %v2416_v58 = vsub.f32 %v2238_v6, %v222_v55  ;;  %v271_v10 = vsub.f32 %v247_v52, %v263_v62 }
  0xaf   :  { %v248_v60 = vmul.f32 %v2416_v58, %v2416_v58 }
  0xb1   :  { %v256_v61 = vpack.c.bf16 %v248_v60, %v248_v60 }
  0xb2   :  { %v171_v63 = vpop.f32.mrf.mxu0  ;;  %v224_v0 = vpop.f32.mrf.mxu1 }
  0xb3   :  { %v225_v1 = vadd.f32 %v224_v0, %v171_v63  ;;  %v321_v2 = vunpack.c.l.b16 %v256_v61  ;;  %v264_v3 = vunpack.c.l.bf16 %v256_v61 }
  0xb5   :  { %v2421_v8 = vsub.f32 %v2271_v20, %v225_v1  ;;  %v328_v9 = vpack.c.b16 %v321_v2, %v320_v5  ;;  %v272_v11 = vsub.f32 %v248_v60, %v264_v3 }
  0xb7   :  { %3336 = vst [vmem:[#allocation5_spill] sm:$0xff] %v2421_v8  ;;  %344 = vmatmul.bf16.vlgmr.msra.gmra.mxu3 %v328_v9  ;;  %v279_v6 = vpack.c.bf16 %v272_v11, %v271_v10  ;;  %v249_v12 = vmul.f32 %v2421_v8, %v2421_v8 }
  0xb9   :  { %291 = vmatmul.bf16.vlgmr.msra.gmra.mxu2 %v279_v6  ;;  %v257_v17 = vpack.c.bf16 %v249_v12, %v249_v12 }
  0xba   :  { %v173_v13 = vpop.f32.mrf.mxu0  ;;  %v226_v14 = vpop.f32.mrf.mxu1 }
  0xbb   :  { %v227_v15 = vadd.f32 %v226_v14, %v173_v13  ;;  %v265_v23 = vunpack.c.l.bf16 %v257_v17  ;;  %v322_v27 = vunpack.c.l.b16 %v257_v17 }
  0xbd   :  { %v2426_v16 = vsub.f32 %v2276_v21, %v227_v15  ;;  %v273_v36 = vsub.f32 %v249_v12, %v265_v23 }
  0xbf   :  { %3337 = vst [vmem:[#allocation6_spill] sm:$0xff] %v2426_v16  ;;  %v250_v20 = vmul.f32 %v2426_v16, %v2426_v16 }
  0xc1   :  { %v258_v22 = vpack.c.bf16 %v250_v20, %v250_v20 }
  0xc2   :  { %v176_v24 = vpop.f32.mrf.mxu0  ;;  %v229_v25 = vpop.f32.mrf.mxu1 }
  0xc3   :  { %v230_v26 = vadd.f32 %v229_v25, %v176_v24  ;;  %v323_v28 = vunpack.c.l.b16 %v258_v22  ;;  %v266_v29 = vunpack.c.l.bf16 %v258_v22 }
  0xc5   :  { %v2431_v30 = vsub.f32 %v2299_v32, %v230_v26  ;;  %v329_v31 = vpack.c.b16 %v323_v28, %v322_v27  ;;  %v274_v37 = vsub.f32 %v250_v20, %v266_v29 }
  0xc7   :  { %3338 = vst [vmem:[#allocation7_spill] sm:$0xff] %v2431_v30  ;;  %349 = vmatmul.bf16.gmra.mxu3 %v329_v31  ;;  %v280_v21 = vpack.c.bf16 %v274_v37, %v273_v36  ;;  %v251_v38 = vmul.f32 %v2431_v30, %v2431_v30 }
  0xc9   :  { %296 = vmatmul.bf16.gmra.mxu2 %v280_v21  ;;  %v259_v43 = vpack.c.bf16 %v251_v38, %v251_v38 }
  0xca   :  { %v178_v39 = vpop.f32.mrf.mxu0  ;;  %v231_v40 = vpop.f32.mrf.mxu1 }
  0xcb   :  { %v232_v41 = vadd.f32 %v231_v40, %v178_v39  ;;  %v267_v47 = vunpack.c.l.bf16 %v259_v43  ;;  %v324_v52 = vunpack.c.l.b16 %v259_v43 }
  0xcd   :  { %v2436_v42 = vsub.f32 %v2304_v33, %v232_v41  ;;  %v275_v60 = vsub.f32 %v251_v38, %v267_v47 }
  0xcf   :  { %3339 = vst [vmem:[#allocation8_spill] sm:$0xff] %v2436_v42  ;;  %v252_v32 = vmul.f32 %v2436_v42, %v2436_v42 }
  0xd1   :  { %v260_v46 = vpack.c.bf16 %v252_v32, %v252_v32 }
  0xd2   :  { %v181_v48 = vpop.f32.mrf.mxu0  ;;  %v234_v49 = vpop.f32.mrf.mxu1 }
  0xd3   :  { %v235_v50 = vadd.f32 %v234_v49, %v181_v48  ;;  %v325_v53 = vunpack.c.l.b16 %v260_v46  ;;  %v268_v54 = vunpack.c.l.bf16 %v260_v46 }
  0xd5   :  { %v2441_v55 = vsub.f32 %v2331_v44, %v235_v50  ;;  %v330_v59 = vpack.c.b16 %v325_v53, %v324_v52  ;;  %v276_v61 = vsub.f32 %v252_v32, %v268_v54 }
  0xd7   :  { %3340 = vst [vmem:[#allocation9_spill] sm:$0xff] %v2441_v55  ;;  %354 = vmatmul.bf16.gmra.mxu3 %v330_v59  ;;  %v281_v33 = vpack.c.bf16 %v276_v61, %v275_v60  ;;  %v253_v62 = vmul.f32 %v2441_v55, %v2441_v55 }
  0xd9   :  { %301 = vmatmul.bf16.gmra.mxu2 %v281_v33  ;;  %v261_v2 = vpack.c.bf16 %v253_v62, %v253_v62 }
  0xda   :  { %v183_v63 = vpop.f32.mrf.mxu0  ;;  %v236_v0 = vpop.f32.mrf.mxu1 }
  0xdb   :  { %v237_v1 = vadd.f32 %v236_v0, %v183_v63  ;;  %v269_v9 = vunpack.c.l.bf16 %v261_v2  ;;  %v326_v12 = vunpack.c.l.b16 %v261_v2 }
  0xdd   :  { %v2446_v5 = vsub.f32 %v2336_v45, %v237_v1  ;;  %v277_v20 = vsub.f32 %v253_v62, %v269_v9 }
  0xdf   :  { %3341 = vst [vmem:[#allocation10_spill] sm:$0xff] %v2446_v5  ;;  %v254_v44 = vmul.f32 %v2446_v5, %v2446_v5 }
  0xe1   :  { %v262_v3 = vpack.c.bf16 %v254_v44, %v254_v44 }
  0xe2   :  { %v518_v10 = vpop.f32.mrf.mxu0  ;;  %v571_v11 = vpop.f32.mrf.mxu1 }
  0xe3   :  { %v572_v6 = vadd.f32 %v571_v11, %v518_v10  ;;  %v327_v13 = vunpack.c.l.b16 %v262_v3  ;;  %v270_v14 = vunpack.c.l.bf16 %v262_v3 }
  0xe5   :  { %v2451_v15 = vsub.f32 %v2349_v56, %v572_v6  ;;  %v331_v17 = vpack.c.b16 %v327_v13, %v326_v12  ;;  %v278_v22 = vsub.f32 %v254_v44, %v270_v14 }
  0xe7   :  { %359 = vmatmul.bf16.gmra.mxu3 %v331_v17  ;;  %v282_v45 = vpack.c.bf16 %v278_v22, %v277_v20  ;;  %v599_v23 = vmul.f32 %v2451_v15, %v2451_v15 }
  0xe9   :  { %306 = vmatmul.bf16.gmra.mxu2 %v282_v45  ;;  %v607_v27 = vpack.c.bf16 %v599_v23, %v599_v23 }
  0xea   :  { %v520_v24 = vpop.f32.mrf.mxu0  ;;  %v573_v25 = vpop.f32.mrf.mxu1 }
  0xeb   :  { %v574_v26 = vadd.f32 %v573_v25, %v520_v24  ;;  %v615_v31 = vunpack.c.l.bf16 %v607_v27  ;;  %v672_v38 = vunpack.c.l.b16 %v607_v27 }
  0xed   :  { %v2456_v28 = vsub.f32 %v2354_v57, %v574_v26  ;;  %v623_v32 = vsub.f32 %v599_v23, %v615_v31 }
  0xef   :  { %v600_v56 = vmul.f32 %v2456_v28, %v2456_v28 }
  0xf1   :  { %v608_v29 = vpack.c.bf16 %v600_v56, %v600_v56 }
  0xf2   :  { %v523_v36 = vpop.f32.mrf.mxu0  ;;  %v576_v37 = vpop.f32.mrf.mxu1 }
  0xf3   :  { %v577_v21 = vadd.f32 %v576_v37, %v523_v36  ;;  %v673_v39 = vunpack.c.l.b16 %v608_v29  ;;  %v616_v40 = vunpack.c.l.bf16 %v608_v29 }
  0xf5   :  { %v2461_v41 = vsub.f32 %v2365_v4, %v577_v21  ;;  %v680_v43 = vpack.c.b16 %v673_v39, %v672_v38  ;;  %v624_v46 = vsub.f32 %v600_v56, %v616_v40 }
  0xf7   :  { %3342 = vst [vmem:[#allocation11_spill] sm:$0xff] %v2461_v41  ;;  %696 = vmatmul.bf16.vlgmr.msrb.gmra.mxu3 %v680_v43  ;;  %v631_v57 = vpack.c.bf16 %v624_v46, %v623_v32  ;;  %v601_v47 = vmul.f32 %v2461_v41, %v2461_v41 }
  0xf9   :  { %643 = vmatmul.bf16.vlgmr.msrb.gmra.mxu2 %v631_v57  ;;  %v609_v53 = vpack.c.bf16 %v601_v47, %v601_v47 }
  0xfa   :  { %v525_v48 = vpop.f32.mrf.mxu0  ;;  %v578_v49 = vpop.f32.mrf.mxu1 }
  0xfb   :  { %v579_v50 = vadd.f32 %v578_v49, %v525_v48  ;;  %v617_v59 = vunpack.c.l.bf16 %v609_v53  ;;  %v674_v62 = vunpack.c.l.b16 %v609_v53 }
  0xfd   :  { %v2466_v52 = vsub.f32 %v2370_v7, %v579_v50  ;;  %v625_v44 = vsub.f32 %v601_v47, %v617_v59 }
  0xff   :  { %3343 = vst [vmem:[#allocation12_spill] sm:$0xff] %v2466_v52  ;;  %v602_v4 = vmul.f32 %v2466_v52, %v2466_v52 }
 0x101   :  { %v610_v54 = vpack.c.bf16 %v602_v4, %v602_v4 }
 0x102   :  { %v528_v60 = vpop.f32.mrf.mxu0  ;;  %v581_v61 = vpop.f32.mrf.mxu1 }
 0x103   :  { %v582_v33 = vadd.f32 %v581_v61, %v528_v60  ;;  %v675_v63 = vunpack.c.l.b16 %v610_v54  ;;  %v618_v0 = vunpack.c.l.bf16 %v610_v54 }
 0x105   :  { %v2471_v1 = vsub.f32 %v2381_v18, %v582_v33  ;;  %v681_v2 = vpack.c.b16 %v675_v63, %v674_v62  ;;  %v626_v3 = vsub.f32 %v602_v4, %v618_v0  ;;  %v855_v33 = vld [vmem:[%s3303_s5 + $0x78] sm:$0xff]  ;;  %v854_v0 = vld [vmem:[%s3303_s5 + $0x70] sm:$0xff] }
 0x106   :  { %v2509_v63 = vand.u32 4294901760, %v855_v33 }
 0x107   :  { %3344 = vst [vmem:[#allocation13_spill] sm:$0xff] %v2471_v1  ;;  %701 = vmatmul.bf16.gmra.mxu3 %v681_v2  ;;  %v632_v7 = vpack.c.bf16 %v626_v3, %v625_v44  ;;  %v603_v9 = vmul.f32 %v2471_v1, %v2471_v1  ;;  %v2518_v44 = vand.u32 4294901760, %v854_v0  ;;  %v853_v3 = vld [vmem:[%s3303_s5 + $0x68] sm:$0xff] }
 0x108   :  { %861 = vmatpush.msra.mxu0 %v2509_v63  ;;  %v2516_v2 = vsub.f32 %v855_v33, %v2509_v63  ;;  %1176 = vmatpush.msra.mxu3 %v2509_v63 }
 0x109   :  { %648 = vmatmul.bf16.gmra.mxu2 %v632_v7  ;;  %v611_v13 = vpack.c.bf16 %v603_v9, %v603_v9 }
 0x10a   :  { %v530_v10 = vpop.f32.mrf.mxu0  ;;  %v583_v11 = vpop.f32.mrf.mxu1  ;;  %v3317_v7 = vand.u32 4294901760, %v2516_v2  ;;  %863 = vmatpush.msra.mxu0 %v2518_v44  ;;  %1088 = vmatpush.msra.mxu2 %v2516_v2 }
 0x10b   :  { %v584_v6 = vadd.f32 %v583_v11, %v530_v10  ;;  %v619_v17 = vunpack.c.l.bf16 %v611_v13  ;;  %v676_v23 = vunpack.c.l.b16 %v611_v13  ;;  %v2529_v10 = vand.u32 4294901760, %v853_v3  ;;  %v852_v11 = vld [vmem:[%s3303_s5 + $0x60] sm:$0xff]  ;;  %1178 = vmatpush.msra.mxu3 %v2518_v44 }
 0x10c   :  { %v960_v13 = vsub.f32 %v2516_v2, %v3317_v7 }
 0x10d   :  { %v2476_v12 = vsub.f32 %v2386_v19, %v584_v6  ;;  %v627_v56 = vsub.f32 %v603_v9, %v619_v17  ;;  %v2527_v9 = vsub.f32 %v854_v0, %v2518_v44  ;;  %865 = vmatpush.msra.mxu0 %v2529_v10  ;;  %v851_v17 = vld [vmem:[%s3303_s5 + $0x58] sm:$0xff]  ;;  %1180 = vmatpush.msra.mxu3 %v2529_v10 }
 0x10f   :  { %3345 = vst [vmem:[#allocation14_spill] sm:$0xff] %v2476_v12  ;;  %v604_v18 = vmul.f32 %v2476_v12, %v2476_v12  ;;  %1091 = vmatpush.msra.mxu2 %v2527_v9 }
 0x111   :  { %v612_v14 = vpack.c.bf16 %v604_v18, %v604_v18 }
 0x112   :  { %v533_v20 = vpop.f32.mrf.mxu0  ;;  %v586_v22 = vpop.f32.mrf.mxu1 }
 0x113   :  { %v587_v45 = vadd.f32 %v586_v22, %v533_v20  ;;  %v677_v24 = vunpack.c.l.b16 %v612_v14  ;;  %v620_v25 = vunpack.c.l.bf16 %v612_v14  ;;  %v2545_v14 = vsub.f32 %v853_v3, %v2529_v10 }
 0x114   :  { %v961_v22 = vand.u32 4294901760, %v960_v13  ;;  %v846_v13 = vld [vmem:[%s3303_s5 + $0x30] sm:$0xff] }
 0x115   :  { %v2481_v26 = vsub.f32 %v2397_v34, %v587_v45  ;;  %v682_v27 = vpack.c.b16 %v677_v24, %v676_v23  ;;  %v628_v29 = vsub.f32 %v604_v18, %v620_v25  ;;  %v3316_v18 = vand.u32 4294901760, %v2527_v9  ;;  %v850_v25 = vld [vmem:[%s3303_s5 + $0x50] sm:$0xff]  ;;  %1094 = vmatpush.msra.mxu2 %v2545_v14 }
 0x116   :  { %v2553_v45 = vand.u32 4294901760, %v852_v11  ;;  %v3312_v24 = vand.u32 4294901760, %v2545_v14  ;;  %962 = vmatpush.msra.mxu1 %v961_v22 }
 0x117   :  { %3346 = vst [vmem:[#allocation15_spill] sm:$0xff] %v2481_v26  ;;  %706 = vmatmul.bf16.gmra.mxu3 %v682_v27  ;;  %v633_v19 = vpack.c.bf16 %v628_v29, %v627_v56  ;;  %v605_v31 = vmul.f32 %v2481_v26, %v2481_v26  ;;  %v966_v23 = vsub.f32 %v2527_v9, %v3316_v18  ;;  %v2567_v56 = vand.u32 4294901760, %v851_v17 }
 0x118   :  { %867 = vmatpush.msra.mxu0 %v2553_v45  ;;  %v2565_v27 = vsub.f32 %v852_v11, %v2553_v45  ;;  %v2569_v29 = vand.u32 4294901760, %v850_v25  ;;  %1182 = vmatpush.msra.mxu3 %v2553_v45 }
 0x119   :  { %653 = vmatmul.bf16.gmra.mxu2 %v633_v19  ;;  %v613_v39 = vpack.c.bf16 %v605_v31, %v605_v31  ;;  %v967_v19 = vand.u32 4294901760, %v966_v23 }
 0x11a   :  { %v535_v36 = vpop.f32.mrf.mxu0  ;;  %v588_v37 = vpop.f32.mrf.mxu1  ;;  %869 = vmatpush.msra.mxu0 %v2567_v56  ;;  %1097 = vmatpush.msra.mxu2 %v2565_v27 }
 0x11b   :  { %v589_v21 = vadd.f32 %v588_v37, %v535_v36  ;;  %v621_v43 = vunpack.c.l.bf16 %v613_v39  ;;  %v678_v32 = vunpack.c.l.b16 %v613_v39  ;;  %v849_v36 = vld [vmem:[%s3303_s5 + $0x48] sm:$0xff]  ;;  %v3311_v37 = vand.u32 4294901760, %v2565_v27  ;;  %968 = vmatpush.msra.mxu1 %v967_v19  ;;  %1184 = vmatpush.msra.mxu3 %v2567_v56 }
 0x11c   :  { %v2584_v39 = vsub.f32 %v850_v25, %v2569_v29  ;;  %871 = vmatpush.msra.mxu0 %v2569_v29  ;;  %v2631_v25 = vand.u32 4294901760, %v846_v13  ;;  %v845_v19 = vld [vmem:[%s3303_s5 + $0x28] sm:$0xff] }
 0x11d   :  { %v2486_v38 = vsub.f32 %v2402_v35, %v589_v21  ;;  %v629_v48 = vsub.f32 %v605_v31, %v621_v43  ;;  %v972_v31 = vsub.f32 %v2545_v14, %v3312_v24  ;;  %v2581_v21 = vsub.f32 %v851_v17, %v2567_v56  ;;  %1186 = vmatpush.msra.mxu3 %v2569_v29 }
 0x11f   :  { %3347 = vst [vmem:[#allocation16_spill] sm:$0xff] %v2486_v38  ;;  %v606_v34 = vmul.f32 %v2486_v38, %v2486_v38  ;;  %1100 = vmatpush.msra.mxu2 %v2581_v21 }
 0x121   :  { %v614_v40 = vpack.c.bf16 %v606_v34, %v606_v34  ;;  %1103 = vmatpush.msra.mxu2 %v2584_v39 }
 0x123   :  { %v679_v46 = vunpack.c.l.b16 %v614_v40  ;;  %v622_v57 = vunpack.c.l.bf16 %v614_v40  ;;  %v2587_v40 = vand.u32 4294901760, %v849_v36 }
 0x125   :  { %v683_v47 = vpack.c.b16 %v679_v46, %v678_v32  ;;  %v630_v49 = vsub.f32 %v606_v34, %v622_v57  ;;  %v973_v34 = vand.u32 4294901760, %v972_v31  ;;  %v978_v32 = vsub.f32 %v2565_v27, %v3311_v37  ;;  %873 = vmatpush.msra.mxu0 %v2587_v40  ;;  %1188 = vmatpush.msra.mxu3 %v2587_v40 }
 0x126   :  { %v3310_v46 = vand.u32 4294901760, %v2581_v21  ;;  %v3309_v57 = vand.u32 4294901760, %v2584_v39  ;;  %v2610_v33 = vsub.f32 %v849_v36, %v2587_v40 }
 0x127   :  { %711 = vmatmul.bf16.gmra.mxu3 %v683_v47  ;;  %v634_v50 = vpack.c.bf16 %v630_v49, %v629_v48  ;;  %974 = vmatpush.msra.mxu1 %v973_v34  ;;  %v848_v47 = vld [vmem:[%s3303_s5 + $0x40] sm:$0xff]  ;;  %v847_v48 = vld [vmem:[%s3303_s5 + $0x38] sm:$0xff] }
 0x128   :  { %v984_v3 = vsub.f32 %v2581_v21, %v3310_v46  ;;  %v990_v11 = vsub.f32 %v2584_v39, %v3309_v57  ;;  %v3308_v17 = vand.u32 4294901760, %v2610_v33  ;;  %v2626_v22 = vand.u32 4294901760, %v848_v47  ;;  %1106 = vmatpush.msra.mxu2 %v2610_v33  ;;  %v843_v57 = vld [vmem:[%s3303_s5 + $0x18] sm:$0xff] }
 0x129   :  { %658 = vmatmul.bf16.gmra.mxu2 %v634_v50  ;;  %v979_v50 = vand.u32 4294901760, %v978_v32 }
 0x12a   :  { %v991_v23 = vand.u32 4294901760, %v990_v11  ;;  %v996_v31 = vsub.f32 %v2610_v33, %v3308_v17  ;;  %875 = vmatpush.msra.mxu0 %v2626_v22  ;;  %v2641_v36 = vsub.f32 %v848_v47, %v2626_v22  ;;  %1190 = vmatpush.msra.mxu3 %v2626_v22 }
 0x12b   :  { %980 = vmatpush.msra.mxu1 %v979_v50  ;;  %v2648_v50 = vsub.f32 %v846_v13, %v2631_v25 }
 0x12c   :  { %v997_v17 = vand.u32 4294901760, %v996_v31  ;;  %1109 = vmatpush.msra.mxu2 %v2641_v36  ;;  %v3313_v47 = vand.u32 4294901760, %v2641_v36 }
 0x12d   :  { %v3315_v31 = vand.u32 4294901760, %v2648_v50 }
 0x13a   :  { %v2490_v53 = vpop.f32.mrf.mxu3 }
 0x13c   :  { %v2492_v4 = vpop.f32.mrf.mxu2 }
 0x13d   :  { %v346_v0 = vadd.f32 %v2490_v53, %v2492_v4  ;;  %v2628_v53 = vand.u32 4294901760, %v847_v48  ;;  %v985_v4 = vand.u32 4294901760, %v984_v3  ;;  %v2650_v3 = vand.u32 4294901760, %v845_v19 }
 0x13f   :  { %v2644_v34 = vsub.f32 %v847_v48, %v2628_v53  ;;  %v365_v32 = vmax.f32 %v346_v0, 0.0  ;;  %986 = vmatpush.msra.mxu1 %v985_v4  ;;  %877 = vmatpush.msra.mxu0 %v2628_v53  ;;  %v844_v0 = vld [vmem:[%s3303_s5 + $0x20] sm:$0xff] }
 0x140   :  { %1192 = vmatpush.msra.mxu3 %v2628_v53  ;;  %v2688_v24 = vand.u32 4294901760, %v844_v0 }
 0x141   :  { %992 = vmatpush.msra.mxu1 %v991_v23  ;;  %v3314_v48 = vand.u32 4294901760, %v2644_v34  ;;  %879 = vmatpush.msra.mxu0 %v2631_v25  ;;  %v2669_v23 = vsub.f32 %v845_v19, %v2650_v3  ;;  %v2675_v46 = vadd.f32 1e-05, %v365_v32  ;;  %v1014_v19 = vsub.f32 %v2648_v50, %v3315_v31  ;;  %v841_v31 = vld [vmem:[%s3303_s5 + $0x8] sm:$0xff] }
 0x142   :  { %v2494_v35 = vpop.f32.mrf.mxu3  ;;  %1112 = vmatpush.msra.mxu2 %v2644_v34  ;;  %1194 = vmatpush.msra.mxu3 %v2631_v25  ;;  %v2705_v38 = vsub.f32 %v844_v0, %v2688_v24 }
 0x143   :  { %998 = vmatpush.msra.mxu1 %v997_v17  ;;  %881 = vmatpush.msra.mxu0 %v2650_v3  ;;  %v3319_v37 = vand.u32 4294901760, %v2669_v23  ;;  %v842_v17 = vld [vmem:[%s3303_s5 + $0x10] sm:$0xff]  ;;  %2066 = vrsqrt.f32 %v2675_v46  ;;  %vm387_vm1 = vweird.f32 %v2675_v46 }
 0x144   :  { %v2496_v54 = vpop.f32.mrf.mxu2  ;;  %1115 = vmatpush.msra.mxu2 %v2648_v50  ;;  %1196 = vmatpush.msra.mxu3 %v2650_v3 }
 0x145   :  { %v348_v13 = vadd.f32 %v2494_v35, %v2496_v54  ;;  %v1002_v35 = vsub.f32 %v2641_v36, %v3313_v47  ;;  %v1008_v54 = vsub.f32 %v2644_v34, %v3314_v48  ;;  %v2695_v48 = vand.u32 4294901760, %v843_v57  ;;  %883 = vmatpush.msra.mxu0 %v2688_v24 }
 0x146   :  { %v1020_v7 = vsub.f32 %v2669_v23, %v3319_v37  ;;  %1118 = vmatpush.msra.mxu2 %v2669_v23  ;;  %v840_v37 = vld [vmem:[%s3303_s5] sm:$0xff]  ;;  %1198 = vmatpush.msra.mxu3 %v2688_v24 }
 0x147   :  { %v1003_v32 = vand.u32 4294901760, %v1002_v35  ;;  %v1009_v47 = vand.u32 4294901760, %v1008_v54  ;;  %v366_v18 = vmax.f32 %v348_v13, 0.0  ;;  %v1015_v35 = vand.u32 4294901760, %v1014_v19  ;;  %885 = vmatpush.msra.mxu0 %v2695_v48 }
 0x148   :  { %v2710_v54 = vsub.f32 %v843_v57, %v2695_v48  ;;  %v2713_v13 = vand.u32 4294901760, %v842_v17  ;;  %1121 = vmatpush.msra.mxu2 %v2705_v38  ;;  %v2724_v19 = vand.u32 4294901760, %v841_v31  ;;  %v1021_v57 = vand.u32 4294901760, %v1020_v7  ;;  %1200 = vmatpush.msra.mxu3 %v2695_v48 }
 0x149   :  { %1004 = vmatpush.msra.mxu1 %v1003_v32  ;;  %v3326_v32 = vand.u32 4294901760, %v2705_v38  ;;  %v2729_v55 = vadd.f32 1e-05, %v366_v18  ;;  %v2755_v1 = vpop.eup %2066 }
 0x14a   :  { %v2498_v59 = vpop.f32.mrf.mxu3  ;;  %v3328_v26 = vand.u32 4294901760, %v2710_v54  ;;  %1124 = vmatpush.msra.mxu2 %v2710_v54  ;;  %887 = vmatpush.msra.mxu0 %v2713_v13  ;;  %vm388_vm0 = vweird.f32 %v2755_v1 }
 0x14b   :  { %1010 = vmatpush.msra.mxu1 %v1009_v47  ;;  %v1026_v7 = vsub.f32 %v2705_v38, %v3326_v32  ;;  %2068 = vrsqrt.f32 %v2729_v55  ;;  %1202 = vmatpush.msra.mxu3 %v2713_v13  ;;  %vm2841_vm2 = vmor %vm387_vm1, %vm388_vm0  ;;  %vm397_vm7 = vweird.f32 %v2729_v55 }
 0x14c   :  { %v2500_v60 = vpop.f32.mrf.mxu2  ;;  %v1032_v18 = vsub.f32 %v2710_v54, %v3328_v26  ;;  %889 = vmatpush.msra.mxu0 %v2724_v19 }
 0x14d   :  { %v351_v0 = vadd.f32 %v2498_v59, %v2500_v60  ;;  %v2734_v59 = vsub.f32 %v842_v17, %v2713_v13  ;;  %v2738_v60 = vand.u32 4294901760, %v840_v37  ;;  %1016 = vmatpush.msra.mxu1 %v1015_v35  ;;  %v2748_v17 = vsub.f32 %v841_v31, %v2724_v19  ;;  %1204 = vmatpush.msra.mxu3 %v2724_v19 }
 0x14e   :  { %v1027_v32 = vand.u32 4294901760, %v1026_v7  ;;  %v1033_v30 = vand.u32 4294901760, %v1032_v18 }
 0x14f   :  { %v367_v47 = vmax.f32 %v351_v0, 0.0  ;;  %v3329_v42 = vand.u32 4294901760, %v2734_v59  ;;  %1127 = vmatpush.msra.mxu2 %v2734_v59  ;;  %v2753_v35 = vsub.f32 %v840_v37, %v2738_v60  ;;  %1022 = vmatpush.msra.mxu1 %v1021_v57  ;;  %v3335_v0 = vand.u32 4294901760, %v2748_v17 }
 0x150   :  { %891 = vmatpush.msra.mxu0 %v2738_v60  ;;  %v382_v37 = vmul.f32 %v2755_v1, %v2675_v46  ;;  %1206 = vmatpush.msra.mxu3 %v2738_v60  ;;  %v3359_v46 = vand.u32 4294901760, %v2648_v50 }
 0x151   :  { %v1038_v31 = vsub.f32 %v2734_v59, %v3329_v42  ;;  %v3334_v26 = vand.u32 4294901760, %v2753_v35  ;;  %1130 = vmatpush.msra.mxu2 %v2748_v17  ;;  %1028 = vmatpush.msra.mxu1 %v1027_v32  ;;  %v2769_v57 = vadd.f32 1e-05, %v367_v47  ;;  %v1044_v32 = vsub.f32 %v2748_v17, %v3335_v0 }
 0x152   :  { %v2502_v61 = vpop.f32.mrf.mxu3  ;;  %v3348_v47 = vand.u32 4294901760, %v2516_v2  ;;  %v3350_v2 = vand.u32 4294901760, %v2545_v14 }
 0x153   :  { %v1039_v18 = vand.u32 4294901760, %v1038_v31  ;;  %1133 = vmatpush.msra.mxu2 %v2753_v35  ;;  %1034 = vmatpush.msra.mxu1 %v1033_v30  ;;  %v1050_v52 = vsub.f32 %v2753_v35, %v3334_v26  ;;  %v1045_v41 = vand.u32 4294901760, %v1044_v32  ;;  %v3349_v30 = vand.u32 4294901760, %v2527_v9 }
 0x154   :  { %v2507_v62 = vpop.f32.mrf.mxu2  ;;  %1259 = vmatpush.msrb.mxu0 %v3348_v47  ;;  %2070 = vrsqrt.f32 %v2769_v57  ;;  %vm407_vm9 = vweird.f32 %v2769_v57 }
 0x155   :  { %v353_v42 = vadd.f32 %v2502_v61, %v2507_v62  ;;  %1040 = vmatpush.msra.mxu1 %v1039_v18  ;;  %v1051_v8 = vand.u32 4294901760, %v1050_v52  ;;  %v2786_v61 = vpop.eup %2068  ;;  %v383_v62 = vmul.f32 %v2755_v1, %v382_v37  ;;  %v3351_v52 = vand.u32 4294901760, %v2565_v27 }
 0x156   :  { %1263 = vmatpush.msrb.mxu0 %v3349_v30  ;;  %vm398_vm4 = vweird.f32 %v2786_v61 }
 0x157   :  { %v368_v26 = vmax.f32 %v353_v42, 0.0  ;;  %1046 = vmatpush.msra.mxu1 %v1045_v41  ;;  %v384_v9 = vmul.f32 0.5, %v383_v62  ;;  %v3352_v42 = vand.u32 4294901760, %v2581_v21  ;;  %vm2898_vm8 = vmor %vm397_vm7, %vm398_vm4 }
 0x158   :  { %1267 = vmatpush.msrb.mxu0 %v3350_v2  ;;  %v3356_v2 = vand.u32 4294901760, %v2644_v34 }
 0x159   :  { %1052 = vmatpush.msra.mxu1 %v1051_v8  ;;  %v2799_v37 = vadd.f32 1e-05, %v368_v26  ;;  %v385_v26 = vsub.f32 1.5, %v384_v9  ;;  %v2848_v9 = vld [vmem:[%s3301_s3] ss:$0 sm:$0xff] }
 0x15a   :  { %v2536_v6 = vpop.f32.mrf.mxu3  ;;  %1271 = vmatpush.msrb.mxu0 %v3351_v52  ;;  %v2806_v41 = vpop.eup %2070 }
 0x15b   :  { %1354 = vmatpush.msrb.mxu1 %v2509_v63  ;;  %v3353_v63 = vand.u32 4294901760, %v2584_v39  ;;  %vm408_vm10 = vweird.f32 %v2806_v41  ;;  %vm417_vm14 = vweird.f32 %v2799_v37 }
 0x15c   :  { %v2551_v20 = vpop.f32.mrf.mxu2  ;;  %1275 = vmatpush.msrb.mxu0 %v3352_v42  ;;  %vm2935_vm12 = vmor %vm407_vm9, %vm408_vm10 }
 0x15d   :  { %1356 = vmatpush.msrb.mxu1 %v2518_v44 }
 0x15e   :  { %1279 = vmatpush.msrb.mxu0 %v3353_v63 }
 0x15f   :  { %1358 = vmatpush.msrb.mxu1 %v2529_v10  ;;  %v386_v10 = vmul.f32 %v2755_v1, %v385_v26  ;;  %v3361_v26 = vand.u32 4294901760, %v2705_v38  ;;  %v3362_v38 = vand.u32 4294901760, %v2710_v54 }
 0x161   :  { %1360 = vmatpush.msrb.mxu1 %v2553_v45 }
 0x162   :  { %v2590_v43 = vpop.f32.mrf.mxu3 }
 0x163   :  { %1362 = vmatpush.msrb.mxu1 %v2567_v56 }
 0x164   :  { %v2606_v49 = vpop.f32.mrf.mxu2 }
 0x165   :  { %1364 = vmatpush.msrb.mxu1 %v2569_v29  ;;  %v390_v29 = vsel %vm2841_vm2, %v2755_v1, %v386_v10 }
 0x167   :  { %1366 = vmatpush.msrb.mxu1 %v2587_v40 }
 0x169   :  { %1368 = vmatpush.msrb.mxu1 %v2626_v22 }
 0x16a   :  { %v2652_v11 = vpop.f32.mrf.mxu3 }
 0x16b   :  { %1370 = vmatpush.msrb.mxu1 %v2628_v53 }
 0x16c   :  { %v2664_v4 = vpop.f32.mrf.mxu2 }
 0x16d   :  { %1372 = vmatpush.msrb.mxu1 %v2631_v25 }
 0x16f   :  { %1374 = vmatpush.msrb.mxu1 %v2650_v3 }
 0x171   :  { %1376 = vmatpush.msrb.mxu1 %v2688_v24 }
 0x172   :  { %v2720_v5 = vpop.f32.mrf.mxu3 }
 0x173   :  { %1378 = vmatpush.msrb.mxu1 %v2695_v48 }
 0x174   :  { %v2731_v12 = vpop.f32.mrf.mxu2 }
 0x175   :  { %1380 = vmatpush.msrb.mxu1 %v2713_v13 }
 0x177   :  { %1382 = vmatpush.msrb.mxu1 %v2724_v19 }
 0x179   :  { %1384 = vmatpush.msrb.mxu1 %v2738_v60 }
 0x17a   :  { %v697_v7 = vpop.f32.mrf.mxu3 }
 0x17c   :  { %v644_v31 = vpop.f32.mrf.mxu2 }
 0x17d   :  { %v698_v16 = vadd.f32 %v697_v7, %v644_v31  ;;  %v392_v7 = vmul.f32 %v2786_v61, %v2729_v55  ;;  %v3355_v31 = vand.u32 4294901760, %v2641_v36  ;;  %v361_v55 = vadd.f32 %v2652_v11, %v2664_v4 }
 0x17f   :  { %v717_v0 = vmax.f32 %v698_v16, 0.0  ;;  %v356_v16 = vadd.f32 %v2536_v6, %v2551_v20  ;;  %v393_v14 = vmul.f32 %v2786_v61, %v392_v7  ;;  %v402_v6 = vmul.f32 %v2806_v41, %v2769_v57 }
 0x181   :  { %v2794_v18 = vadd.f32 1e-05, %v717_v0  ;;  %v369_v20 = vmax.f32 %v356_v16, 0.0  ;;  %v3354_v0 = vand.u32 4294901760, %v2610_v33  ;;  %v394_v47 = vmul.f32 0.5, %v393_v14 }
 0x182   :  { %v699_v32 = vpop.f32.mrf.mxu3  ;;  %v403_v45 = vmul.f32 %v2806_v41, %v402_v6  ;;  %v358_v16 = vadd.f32 %v2590_v43, %v2606_v49  ;;  %v464_v43 = vmul.f32 %v2848_v9, %v390_v29  ;;  %v2873_v49 = vld [vmem:[%s3302_s4] ss:$0 sm:$0xff] }
 0x183   :  { %2072 = vrsqrt.f32 %v2794_v18  ;;  %1283 = vmatpush.msrb.mxu0 %v3354_v0  ;;  %v2831_v33 = vadd.f32 1e-05, %v369_v20  ;;  %v395_v34 = vsub.f32 1.5, %v394_v47  ;;  %vm739_vm5 = vweird.f32 %v2794_v18 }
 0x184   :  { %v646_v8 = vpop.f32.mrf.mxu2  ;;  %2074 = vrsqrt.f32 %v2799_v37  ;;  %v370_v6 = vmax.f32 %v358_v16, 0.0 }
 0x185   :  { %v700_v27 = vadd.f32 %v699_v32, %v646_v8  ;;  %1287 = vmatpush.msrb.mxu0 %v3355_v31  ;;  %v404_v8 = vmul.f32 0.5, %v403_v45  ;;  %v396_v40 = vmul.f32 %v2786_v61, %v395_v34  ;;  %vm427_vm9 = vweird.f32 %v2831_v33 }
 0x186   :  { %v2911_v45 = vadd.f32 1e-05, %v370_v6 }
 0x187   :  { %v718_v21 = vmax.f32 %v700_v27, 0.0  ;;  %1291 = vmatpush.msrb.mxu0 %v3356_v2  ;;  %v3360_v27 = vand.u32 4294901760, %v2669_v23  ;;  %v405_v0 = vsub.f32 1.5, %v404_v8  ;;  %v400_v25 = vsel %vm2898_vm8, %v2786_v61, %v396_v40 }
 0x188   :  { %v465_v3 = vmul.f32 %v2848_v9, %v400_v25  ;;  %v363_v40 = vadd.f32 %v2720_v5, %v2731_v12 }
 0x189   :  { %v2819_v44 = vpop.eup %2072  ;;  %v2821_v39 = vadd.f32 1e-05, %v718_v21  ;;  %1295 = vmatpush.msrb.mxu0 %v3359_v46 }
 0x18a   :  { %v734_v30 = vmul.f32 %v2819_v44, %v2794_v18  ;;  %v702_v62 = vpop.f32.mrf.mxu3  ;;  %v2839_v52 = vpop.eup %2074  ;;  %vm740_vm3 = vweird.f32 %v2819_v44 }
 0x18b   :  { %2076 = vrsqrt.f32 %v2821_v39  ;;  %1299 = vmatpush.msrb.mxu0 %v3360_v27  ;;  %v412_v50 = vmul.f32 %v2839_v52, %v2799_v37  ;;  %vm741_vm6 = vmor %vm739_vm5, %vm740_vm3  ;;  %vm749_vm13 = vweird.f32 %v2821_v39  ;;  %vm418_vm0 = vweird.f32 %v2839_v52 }
 0x18c   :  { %v735_v36 = vmul.f32 %v2819_v44, %v734_v30  ;;  %v649_v7 = vpop.f32.mrf.mxu2  ;;  %2078 = vrsqrt.f32 %v2831_v33  ;;  %vm2984_vm2 = vmor %vm417_vm14, %vm418_vm0 }
 0x18d   :  { %v703_v32 = vadd.f32 %v702_v62, %v649_v7  ;;  %1303 = vmatpush.msrb.mxu0 %v3361_v26  ;;  %v413_v47 = vmul.f32 %v2839_v52, %v412_v50  ;;  %v3365_v62 = vand.u32 4294901760, %v2734_v59  ;;  %v406_v7 = vmul.f32 %v2806_v41, %v405_v0 }
 0x18e   :  { %v736_v42 = vmul.f32 0.5, %v735_v36  ;;  %v472_v36 = vmul.f32 %v464_v43, %v2411_v51  ;;  %v3366_v59 = vand.u32 4294901760, %v2748_v17  ;;  %v3367_v17 = vand.u32 4294901760, %v2753_v35 }
 0x18f   :  { %v719_v14 = vmax.f32 %v703_v32, 0.0  ;;  %1307 = vmatpush.msrb.mxu0 %v3362_v38  ;;  %v414_v56 = vmul.f32 0.5, %v413_v47  ;;  %v371_v32 = vmax.f32 %v361_v55, 0.0  ;;  %v410_v35 = vsel %vm2935_vm12, %v2806_v41, %v406_v7 }
 0x190   :  { %v737_v63 = vsub.f32 1.5, %v736_v42  ;;  %v473_v26 = vmul.f32 %v465_v3, %v2416_v58  ;;  %v466_v13 = vmul.f32 %v2848_v9, %v410_v35  ;;  %v3373_v3 = vld [vmem:[#allocation11_spill] sm:$0xff] }
 0x191   :  { %v2865_v1 = vpop.eup %2076  ;;  %v2875_v23 = vadd.f32 1e-05, %v719_v14  ;;  %1311 = vmatpush.msrb.mxu0 %v3365_v62  ;;  %v2958_v41 = vadd.f32 1e-05, %v371_v32 }
 0x192   :  { %v738_v22 = vmul.f32 %v2819_v44, %v737_v63  ;;  %v744_v20 = vmul.f32 %v2865_v1, %v2821_v39  ;;  %v704_v21 = vpop.f32.mrf.mxu3  ;;  %v2894_v53 = vpop.eup %2078  ;;  %vm750_vm11 = vweird.f32 %v2865_v1  ;;  %v415_v39 = vsub.f32 1.5, %v414_v56 }
 0x193   :  { %2080 = vrsqrt.f32 %v2875_v23  ;;  %1315 = vmatpush.msrb.mxu0 %v3366_v59  ;;  %v422_v61 = vmul.f32 %v2894_v53, %v2831_v33  ;;  %vm751_vm15 = vmor %vm749_vm13, %vm750_vm11  ;;  %vm759_vm3 = vweird.f32 %v2875_v23  ;;  %v3372_v59 = vld [vmem:[#allocation5_spill] sm:$0xff]  ;;  %vm428_vm5 = vweird.f32 %v2894_v53 }
 0x194   :  { %v742_v18 = vsel %vm741_vm6, %v2819_v44, %v738_v22  ;;  %v745_v31 = vmul.f32 %v2865_v1, %v744_v20  ;;  %v651_v10 = vpop.f32.mrf.mxu2  ;;  %2082 = vrsqrt.f32 %v2911_v45  ;;  %v416_v0 = vmul.f32 %v2839_v52, %v415_v39  ;;  %vm3033_vm10 = vmor %vm427_vm9, %vm428_vm5 }
 0x195   :  { %v816_v54 = vmul.f32 %v2873_v49, %v742_v18  ;;  %v705_v44 = vadd.f32 %v704_v21, %v651_v10  ;;  %1319 = vmatpush.msrb.mxu0 %v3367_v17  ;;  %v423_v8 = vmul.f32 %v2894_v53, %v422_v61  ;;  %v372_v18 = vmax.f32 %v363_v40, 0.0 }
 0x196   :  { %v746_v2 = vmul.f32 0.5, %v745_v31  ;;  %v474_v56 = vmul.f32 %v466_v13, %v3372_v59  ;;  %vm447_vm5 = vweird.f32 %v2958_v41 }
 0x197   :  { %v720_v11 = vmax.f32 %v705_v44, 0.0  ;;  %v824_v4 = vmul.f32 %v816_v54, %v2451_v15  ;;  %v424_v38 = vmul.f32 0.5, %v423_v8  ;;  %v420_v54 = vsel %vm2984_vm2, %v2839_v52, %v416_v0 }
 0x198   :  { %v747_v34 = vsub.f32 1.5, %v746_v2 }
 0x199   :  { %v2924_v51 = vpop.eup %2080  ;;  %v2927_v46 = vadd.f32 1e-05, %v720_v11  ;;  %v832_v15 = vsub.f32 %v472_v36, %v824_v4  ;;  %v425_v25 = vsub.f32 1.5, %v424_v38  ;;  %v3007_v11 = vadd.f32 1e-05, %v372_v18 }
 0x19a   :  { %v748_v24 = vmul.f32 %v2865_v1, %v747_v34  ;;  %v754_v16 = vmul.f32 %v2924_v51, %v2875_v23  ;;  %v707_v42 = vpop.f32.mrf.mxu3  ;;  %v2970_v21 = vpop.eup %2082  ;;  %vm760_vm1 = vweird.f32 %v2924_v51 }
 0x19b   :  { %2084 = vrsqrt.f32 %v2927_v46  ;;  %v2952_v57 = vand.u32 4294901760, %v832_v15  ;;  %v432_v30 = vmul.f32 %v2970_v21, %v2911_v45  ;;  %vm761_vm4 = vmor %vm759_vm3, %vm760_vm1  ;;  %vm769_vm7 = vweird.f32 %v2927_v46 }
 0x19c   :  { %v752_v14 = vsel %vm751_vm15, %v2865_v1, %v748_v24  ;;  %v755_v48 = vmul.f32 %v2924_v51, %v754_v16  ;;  %v654_v27 = vpop.f32.mrf.mxu2  ;;  %2086 = vrsqrt.f32 %v2958_v41  ;;  %v426_v24 = vmul.f32 %v2894_v53, %v425_v25 }
 0x19d   :  { %v817_v50 = vmul.f32 %v2873_v49, %v752_v14  ;;  %v708_v63 = vadd.f32 %v707_v42, %v654_v27  ;;  %1054 = vmatmul.f32.vlgmr.msra.gmra.mxu1 %v2952_v57  ;;  %v893_v43 = vsub.f32 %v832_v15, %v2952_v57  ;;  %v433_v61 = vmul.f32 %v2970_v21, %v432_v30 }
 0x19e   :  { %v756_v1 = vmul.f32 0.5, %v755_v48  ;;  %v467_v15 = vmul.f32 %v2848_v9, %v420_v54  ;;  %vm438_vm12 = vweird.f32 %v2970_v21  ;;  %vm437_vm15 = vweird.f32 %v2911_v45 }
 0x19f   :  { %v721_v6 = vmax.f32 %v708_v63, 0.0  ;;  %1136 = vmatmul.f32.vlgmr.msra.gmra.mxu2 %v893_v43  ;;  %v894_v22 = vand.u32 4294901760, %v893_v43  ;;  %v825_v20 = vmul.f32 %v817_v50, %v2456_v28  ;;  %v434_v48 = vmul.f32 0.5, %v433_v61  ;;  %vm3066_vm0 = vmor %vm437_vm15, %vm438_vm12 }
 0x1a0   :  { %v757_v47 = vsub.f32 1.5, %v756_v1 }
 0x1a1   :  { %v2975_v58 = vpop.eup %2084  ;;  %v2978_v5 = vadd.f32 1e-05, %v721_v6  ;;  %1210 = vmatmul.f32.vlgmr.msra.gmra.mxu3 %v894_v22  ;;  %v895_v12 = vsub.f32 %v893_v43, %v894_v22  ;;  %v833_v19 = vsub.f32 %v473_v26, %v825_v20  ;;  %v430_v6 = vsel %vm3033_vm10, %v2894_v53, %v426_v24  ;;  %v3376_v20 = vld [vmem:[#allocation6_spill] sm:$0xff]  ;;  %v3381_v24 = vld [vmem:[#allocation13_spill] sm:$0xff] }
 0x1a2   :  { %v758_v60 = vmul.f32 %v2924_v51, %v757_v47  ;;  %v764_v31 = vmul.f32 %v2975_v58, %v2927_v46  ;;  %v709_v10 = vpop.f32.mrf.mxu3  ;;  %v3010_v52 = vpop.eup %2086  ;;  %vm770_vm6 = vweird.f32 %v2975_v58  ;;  %v475_v0 = vmul.f32 %v467_v15, %v3376_v20 }
 0x1a3   :  { %2088 = vrsqrt.f32 %v2978_v5  ;;  %v896_v37 = vand.u32 4294901760, %v895_v12  ;;  %v2997_v55 = vand.u32 4294901760, %v833_v19  ;;  %vm771_vm8 = vmor %vm769_vm7, %vm770_vm6  ;;  %v442_v63 = vmul.f32 %v3010_v52, %v2958_v41  ;;  %v3377_v12 = vld [vmem:[#allocation12_spill] sm:$0xff] }
 0x1a4   :  { %v762_v23 = vsel %vm761_vm4, %v2924_v51, %v758_v60  ;;  %v765_v44 = vmul.f32 %v2975_v58, %v764_v31  ;;  %v656_v62 = vpop.f32.mrf.mxu2  ;;  %2090 = vrsqrt.f32 %v3007_v11  ;;  %v435_v38 = vsub.f32 1.5, %v434_v48 }
 0x1a5   :  { %v818_v2 = vmul.f32 %v2873_v49, %v762_v23  ;;  %v710_v36 = vadd.f32 %v709_v10, %v656_v62  ;;  %897 = vmatmul.f32.vlgmr.msra.gmra.mxu0 %v896_v37  ;;  %1058 = vmatmul.f32.gmra.mxu1 %v2997_v55  ;;  %v901_v7 = vsub.f32 %v833_v19, %v2997_v55  ;;  %vm779_vm13 = vweird.f32 %v2978_v5 }
 0x1a6   :  { %v766_v4 = vmul.f32 0.5, %v765_v44  ;;  %v443_v18 = vmul.f32 %v3010_v52, %v442_v63  ;;  %v468_v37 = vmul.f32 %v2848_v9, %v430_v6  ;;  %v436_v44 = vmul.f32 %v2970_v21, %v435_v38 }
 0x1a7   :  { %v722_v34 = vmax.f32 %v710_v36, 0.0  ;;  %1141 = vmatmul.f32.gmra.mxu2 %v901_v7  ;;  %v902_v51 = vand.u32 4294901760, %v901_v7  ;;  %v826_v32 = vmul.f32 %v818_v2, %v3373_v3  ;;  %vm448_vm2 = vweird.f32 %v3010_v52 }
 0x1a8   :  { %v767_v17 = vsub.f32 1.5, %v766_v4  ;;  %v444_v2 = vmul.f32 0.5, %v443_v18  ;;  %v440_v45 = vsel %vm3066_vm0, %v2970_v21, %v436_v44  ;;  %vm3092_vm6 = vmor %vm447_vm5, %vm448_vm2  ;;  %vm1434_vm0 = vcmask 261120  }
 0x1a9   :  { %v2089_v29 = vpop.eup %2088  ;;  %v3018_v16 = vadd.f32 1e-05, %v722_v34  ;;  %1216 = vmatmul.f32.gmra.mxu3 %v902_v51  ;;  %v903_v42 = vsub.f32 %v901_v7, %v902_v51  ;;  %v834_v35 = vsub.f32 %v474_v56, %v826_v32  ;;  %v3380_v32 = vld [vmem:[#allocation7_spill] sm:$0xff] }
 0x1aa   :  { %v768_v39 = vmul.f32 %v2975_v58, %v767_v17  ;;  %v774_v8 = vmul.f32 %v2089_v29, %v2978_v5  ;;  %v712_v14 = vpop.f32.mrf.mxu3  ;;  %v3045_v28 = vpop.eup %2090  ;;  %vm780_vm11 = vweird.f32 %v2089_v29  ;;  %v476_v15 = vmul.f32 %v468_v37, %v3380_v32 }
 0x1ab   :  { %2092 = vrsqrt.f32 %v3018_v16  ;;  %v904_v27 = vand.u32 4294901760, %v903_v42  ;;  %v3025_v50 = vand.u32 4294901760, %v834_v35  ;;  %vm781_vm14 = vmor %vm779_vm13, %vm780_vm11  ;;  %v452_v36 = vmul.f32 %v3045_v28, %v3007_v11 }
 0x1ac   :  { %v772_v43 = vsel %vm771_vm8, %v2975_v58, %v768_v39  ;;  %v775_v40 = vmul.f32 %v2089_v29, %v774_v8  ;;  %v659_v1 = vpop.f32.mrf.mxu2  ;;  %vm789_vm3 = vweird.f32 %v3018_v16  ;;  %vm458_vm10 = vweird.f32 %v3045_v28 }
 0x1ad   :  { %v819_v26 = vmul.f32 %v2873_v49, %v772_v43  ;;  %v713_v13 = vadd.f32 %v712_v14, %v659_v1  ;;  %905 = vmatmul.f32.gmra.mxu0 %v904_v27  ;;  %1062 = vmatmul.f32.gmra.mxu1 %v3025_v50  ;;  %v909_v33 = vsub.f32 %v834_v35, %v3025_v50  ;;  %v445_v35 = vsub.f32 1.5, %v444_v2 }
 0x1ae   :  { %v776_v22 = vmul.f32 0.5, %v775_v40  ;;  %v453_v39 = vmul.f32 %v3045_v28, %v452_v36  ;;  %v469_v40 = vmul.f32 %v2848_v9, %v440_v45  ;;  %vm457_vm11 = vweird.f32 %v3007_v11 }
 0x1af   :  { %v723_v47 = vmax.f32 %v713_v13, 0.0  ;;  %1146 = vmatmul.f32.gmra.mxu2 %v909_v33  ;;  %v910_v58 = vand.u32 4294901760, %v909_v33  ;;  %v827_v19 = vmul.f32 %v819_v26, %v3377_v12  ;;  %v446_v26 = vmul.f32 %v3010_v52, %v445_v35  ;;  %v3385_v12 = vld [vmem:[#allocation14_spill] sm:$0xff]  ;;  %vm459_vm12 = vmor %vm457_vm11, %vm458_vm10 }
 0x1b0   :  { %v777_v60 = vsub.f32 1.5, %v776_v22  ;;  %v454_v13 = vmul.f32 0.5, %v453_v39  ;;  %v3388_v39 = vld [vmem:[#allocation10_spill] sm:$0xff] }
 0x1b1   :  { %v2093_v31 = vpop.eup %2092  ;;  %v3049_v10 = vadd.f32 1e-05, %v723_v47  ;;  %1222 = vmatmul.f32.gmra.mxu3 %v910_v58  ;;  %v911_v53 = vsub.f32 %v909_v33, %v910_v58  ;;  %v835_v30 = vsub.f32 %v475_v0, %v827_v19  ;;  %v3384_v47 = vld [vmem:[#allocation8_spill] sm:$0xff]  ;;  %v450_v18 = vsel %vm3092_vm6, %v3010_v52, %v446_v26 }
 0x1b2   :  { %v778_v54 = vmul.f32 %v2089_v29, %v777_v60  ;;  %v784_v23 = vmul.f32 %v2093_v31, %v3018_v16  ;;  %v714_v59 = vpop.f32.mrf.mxu3  ;;  %vm790_vm1 = vweird.f32 %v2093_v31  ;;  %v477_v58 = vmul.f32 %v469_v40, %v3384_v47 }
 0x1b3   :  { %2094 = vrsqrt.f32 %v3049_v10  ;;  %v912_v62 = vand.u32 4294901760, %v911_v53  ;;  %v3056_v25 = vand.u32 4294901760, %v835_v30  ;;  %vm791_vm4 = vmor %vm789_vm3, %vm790_vm1  ;;  %v455_v60 = vsub.f32 1.5, %v454_v13 }
 0x1b4   :  { %v782_v7 = vsel %vm781_vm14, %v2089_v29, %v778_v54  ;;  %v785_v4 = vmul.f32 %v2093_v31, %v784_v23  ;;  %v661_v56 = vpop.f32.mrf.mxu2  ;;  %vm799_vm8 = vweird.f32 %v3049_v10  ;;  %v470_v23 = vmul.f32 %v2848_v9, %v450_v18 }
 0x1b5   :  { %v820_v5 = vmul.f32 %v2873_v49, %v782_v7  ;;  %v715_v61 = vadd.f32 %v714_v59, %v661_v56  ;;  %913 = vmatmul.f32.gmra.mxu0 %v912_v62  ;;  %1066 = vmatmul.f32.gmra.mxu1 %v3056_v25  ;;  %v917_v34 = vsub.f32 %v835_v30, %v3056_v25  ;;  %v3386_v56 = vld [vmem:[#allocation9_spill] sm:$0xff] }
 0x1b6   :  { %v786_v3 = vmul.f32 0.5, %v785_v4  ;;  %v456_v2 = vmul.f32 %v3045_v28, %v455_v60  ;;  %v1427_v60 = vld [vmem:[%s3305_s7 + $0x8] sm:$0xff] }
 0x1b7   :  { %v724_v17 = vmax.f32 %v715_v61, 0.0  ;;  %1151 = vmatmul.f32.gmra.mxu2 %v917_v34  ;;  %v918_v29 = vand.u32 4294901760, %v917_v34  ;;  %v828_v42 = vmul.f32 %v820_v5, %v3381_v24  ;;  %v478_v5 = vmul.f32 %v470_v23, %v3386_v56  ;;  %v3387_v61 = vld [vmem:[#allocation15_spill] sm:$0xff] }
 0x1b8   :  { %v787_v8 = vsub.f32 1.5, %v786_v3  ;;  %v460_v51 = vsel %vm459_vm12, %v3045_v28, %v456_v2  ;;  %v1426_v2 = vld [vmem:[%s3305_s7] sm:$0xff] }
 0x1b9   :  { %v2095_v14 = vpop.eup %2094  ;;  %v3076_v48 = vadd.f32 1e-05, %v724_v17  ;;  %1228 = vmatmul.f32.gmra.mxu3 %v918_v29  ;;  %v919_v27 = vsub.f32 %v917_v34, %v918_v29  ;;  %v836_v63 = vsub.f32 %v476_v15, %v828_v42  ;;  %v471_v11 = vmul.f32 %v2848_v9, %v460_v51 }
 0x1ba   :  { %v788_v43 = vmul.f32 %v2093_v31, %v787_v8  ;;  %v794_v21 = vmul.f32 %v2095_v14, %v3049_v10  ;;  %vm800_vm7 = vweird.f32 %v2095_v14 }
 0x1bb   :  { %2096 = vrsqrt.f32 %v3076_v48  ;;  %v920_v1 = vand.u32 4294901760, %v919_v27  ;;  %v3083_v46 = vand.u32 4294901760, %v836_v63  ;;  %vm801_vm9 = vmor %vm799_vm8, %vm800_vm7  ;;  %vm809_vm14 = vweird.f32 %v3076_v48 }
 0x1bc   :  { %v792_v33 = vsel %vm791_vm4, %v2093_v31, %v788_v43  ;;  %v795_v6 = vmul.f32 %v2095_v14, %v794_v21  ;;  %v479_v8 = vmul.f32 %v471_v11, %v3388_v39  ;;  %vm2005_vm4 = vcmask 130048  }
 0x1bd   :  { %v821_v22 = vmul.f32 %v2873_v49, %v792_v33  ;;  %921 = vmatmul.f32.gmra.mxu0 %v920_v1  ;;  %1070 = vmatmul.f32.gmra.mxu1 %v3083_v46  ;;  %v925_v16 = vsub.f32 %v836_v63, %v3083_v46 }
 0x1be   :  { %v796_v20 = vmul.f32 0.5, %v795_v6 }
 0x1bf   :  { %1156 = vmatmul.f32.gmra.mxu2 %v925_v16  ;;  %v926_v38 = vand.u32 4294901760, %v925_v16  ;;  %v829_v19 = vmul.f32 %v821_v22, %v3385_v12  ;;  %v1428_v22 = vld [vmem:[%s3305_s7 + $0x10] sm:$0xff] }
 0x1c0   :  { %v797_v31 = vsub.f32 1.5, %v796_v20  ;;  %v1473_v0 = vand.u32 4294901760, %v1428_v22 }
 0x1c1   :  { %v2097_v41 = vpop.eup %2096  ;;  %1234 = vmatmul.f32.gmra.mxu3 %v926_v38  ;;  %v927_v53 = vsub.f32 %v925_v16, %v926_v38  ;;  %v837_v30 = vsub.f32 %v477_v58, %v829_v19 }
 0x1c2   :  { %v798_v37 = vmul.f32 %v2095_v14, %v797_v31  ;;  %v804_v54 = vmul.f32 %v2097_v41, %v3076_v48  ;;  %vm810_vm13 = vweird.f32 %v2097_v41  ;;  %v1563_v38 = vsub.f32 %v1428_v22, %v1473_v0 }
 0x1c3   :  { %v928_v44 = vand.u32 4294901760, %v927_v53  ;;  %v932_v62 = vand.u32 4294901760, %v837_v30  ;;  %vm811_vm15 = vmor %vm809_vm14, %vm810_vm13  ;;  %v1475_v53 = vand.u32 4294901760, %v1427_v60 }
 0x1c4   :  { %v802_v52 = vsel %vm801_vm9, %v2095_v14, %v798_v37  ;;  %v805_v36 = vmul.f32 %v2097_v41, %v804_v54  ;;  %v3389_v14 = vld [vmem:[#allocation16_spill] sm:$0xff]  ;;  %v1564_v47 = vand.u32 4294901760, %v1563_v38 }
 0x1c5   :  { %v822_v7 = vmul.f32 %v2873_v49, %v802_v52  ;;  %929 = vmatmul.f32.gmra.mxu0 %v928_v44  ;;  %1074 = vmatmul.f32.gmra.mxu1 %v932_v62  ;;  %v933_v4 = vsub.f32 %v837_v30, %v932_v62  ;;  %v1569_v30 = vsub.f32 %v1427_v60, %v1475_v53  ;;  %v1477_v52 = vand.u32 4294901760, %v1426_v2 }
 0x1c6   :  { %v806_v10 = vmul.f32 0.5, %v805_v36  ;;  %v1565_v58 = vsub.f32 %v1563_v38, %v1564_v47 }
 0x1c7   :  { %1161 = vmatmul.f32.gmra.mxu2 %v933_v4  ;;  %v934_v59 = vand.u32 4294901760, %v933_v4  ;;  %v830_v34 = vmul.f32 %v822_v7, %v3387_v61  ;;  %v1570_v37 = vand.u32 4294901760, %v1569_v30 }
 0x1c8   :  { %v807_v3 = vsub.f32 1.5, %v806_v10  ;;  %v1566_v18 = vand.u32 4294901760, %v1565_v58 }
 0x1c9   :  { %1240 = vmatmul.f32.gmra.mxu3 %v934_v59  ;;  %v935_v32 = vsub.f32 %v933_v4, %v934_v59  ;;  %v838_v15 = vsub.f32 %v478_v5, %v830_v34  ;;  %v1571_v54 = vsub.f32 %v1569_v30, %v1570_v37  ;;  %v1575_v4 = vsub.f32 %v1426_v2, %v1477_v52  ;;  %v3161_v5 = vld [vmem:[%s3304_s6] ss:$0 sm:$0xff] }
 0x1ca   :  { %v808_v45 = vmul.f32 %v2097_v41, %v807_v3 }
 0x1cb   :  { %v936_v17 = vand.u32 4294901760, %v935_v32  ;;  %v940_v29 = vand.u32 4294901760, %v838_v15  ;;  %v1576_v59 = vand.u32 4294901760, %v1575_v4 }
 0x1cc   :  { %v812_v24 = vsel %vm811_vm15, %v2097_v41, %v808_v45 }
 0x1cd   :  { %v823_v42 = vmul.f32 %v2873_v49, %v812_v24  ;;  %937 = vmatmul.f32.gmra.mxu0 %v936_v17  ;;  %1078 = vmatmul.f32.gmra.mxu1 %v940_v29  ;;  %v941_v35 = vsub.f32 %v838_v15, %v940_v29  ;;  %v1577_v56 = vsub.f32 %v1575_v4, %v1576_v59 }
 0x1cf   :  { %1166 = vmatmul.f32.gmra.mxu2 %v941_v35  ;;  %v942_v28 = vand.u32 4294901760, %v941_v35  ;;  %v831_v27 = vmul.f32 %v823_v42, %v3389_v14  ;;  %v1578_v34 = vand.u32 4294901760, %v1577_v56 }
 0x1d1   :  { %1246 = vmatmul.f32.gmra.mxu3 %v942_v28  ;;  %v943_v63 = vsub.f32 %v941_v35, %v942_v28  ;;  %v839_v48 = vsub.f32 %v479_v8, %v831_v27 }
 0x1d3   :  { %v944_v43 = vand.u32 4294901760, %v943_v63  ;;  %v948_v9 = vand.u32 4294901760, %v839_v48 }
 0x1d5   :  { %945 = vmatmul.f32.gmra.mxu0 %v944_v43  ;;  %1082 = vmatmul.f32.gmra.mxu1 %v948_v9  ;;  %v949_v21 = vsub.f32 %v839_v48, %v948_v9 }
 0x1d7   :  { %1171 = vmatmul.f32.gmra.mxu2 %v949_v21  ;;  %v950_v40 = vand.u32 4294901760, %v949_v21 }
 0x1d9   :  { %1252 = vmatmul.f32.gmra.mxu3 %v950_v40  ;;  %v951_v49 = vsub.f32 %v949_v21, %v950_v40 }
 0x1db   :  { %v952_v1 = vand.u32 4294901760, %v951_v49 }
 0x1dd   :  { %953 = vmatmul.f32.gmra.mxu0 %v952_v1  ;;  %1386 = vmatmul.f32.vlgmr.msrb.gmra.mxu1 %v2952_v57 }
 0x1e5   :  { %1321 = vmatmul.f32.vlgmr.msrb.gmra.mxu0 %v2952_v57  ;;  %1390 = vmatmul.f32.gmra.mxu1 %v2997_v55  ;;  %v1429_v57 = vld [vmem:[%s3305_s7 + $0x18] sm:$0xff] }
 0x1ed   :  { %1325 = vmatmul.f32.gmra.mxu0 %v2997_v55  ;;  %1394 = vmatmul.f32.gmra.mxu1 %v3025_v50 }
 0x1f5   :  { %1329 = vmatmul.f32.gmra.mxu0 %v3025_v50  ;;  %1398 = vmatmul.f32.gmra.mxu1 %v3056_v25  ;;  %v1471_v50 = vand.u32 4294901760, %v1429_v57 }
 0x1f7   :  { %1472 = vmatpush.msrb.mxu2 %v1471_v50  ;;  %v1557_v26 = vsub.f32 %v1429_v57, %v1471_v50  ;;  %1691 = vmatpush.msra.mxu1 %v1471_v50 }
 0x1f9   :  { %1627 = vmatpush.msra.mxu0 %v1557_v26  ;;  %1474 = vmatpush.msrb.mxu2 %v1473_v0 }
 0x1fa   :  { %1693 = vmatpush.msra.mxu1 %v1473_v0 }
 0x1fb   :  { %1630 = vmatpush.msra.mxu0 %v1563_v38  ;;  %1476 = vmatpush.msrb.mxu2 %v1475_v53 }
 0x1fc   :  { %1695 = vmatpush.msra.mxu1 %v1475_v53 }
 0x1fd   :  { %1333 = vmatmul.f32.gmra.mxu0 %v3056_v25  ;;  %1402 = vmatmul.f32.gmra.mxu1 %v3083_v46  ;;  %v1558_v25 = vand.u32 4294901760, %v1557_v26 }
 0x1fe   :  { %1633 = vmatpush.msra.mxu0 %v1569_v30  ;;  %1478 = vmatpush.msrb.mxu2 %v1477_v52 }
 0x1ff   :  { %v1559_v13 = vsub.f32 %v1557_v26, %v1558_v25  ;;  %1697 = vmatpush.msra.mxu1 %v1477_v52 }
 0x200   :  { %1762 = vmatpush.msra.mxu2 %v1558_v25  ;;  %1636 = vmatpush.msra.mxu0 %v1575_v4 }
 0x201   :  { %v1560_v6 = vand.u32 4294901760, %v1559_v13 }
 0x202   :  { %1766 = vmatpush.msra.mxu2 %v1564_v47 }
 0x203   :  { %1561 = vmatpush.msrb.mxu3 %v1560_v6 }
 0x204   :  { %1770 = vmatpush.msra.mxu2 %v1570_v37 }
 0x205   :  { %1337 = vmatmul.f32.gmra.mxu0 %v3083_v46  ;;  %1406 = vmatmul.f32.gmra.mxu1 %v932_v62 }
 0x206   :  { %1567 = vmatpush.msrb.mxu3 %v1566_v18  ;;  %1774 = vmatpush.msra.mxu2 %v1576_v59 }
 0x20d   :  { %1341 = vmatmul.f32.gmra.mxu0 %v932_v62  ;;  %1410 = vmatmul.f32.gmra.mxu1 %v940_v29  ;;  %v1572_v62 = vand.u32 4294901760, %v1571_v54 }
 0x20f   :  { %1573 = vmatpush.msrb.mxu3 %v1572_v62 }
 0x211   :  { %1579 = vmatpush.msrb.mxu3 %v1578_v34 }
 0x213   :  { %1821 = vmatpush.msra.mxu3 %v1471_v50 }
 0x215   :  { %1345 = vmatmul.f32.gmra.mxu0 %v940_v29  ;;  %1414 = vmatmul.f32.gmra.mxu1 %v948_v9 }
 0x216   :  { %1823 = vmatpush.msra.mxu3 %v1473_v0 }
 0x218   :  { %1825 = vmatpush.msra.mxu3 %v1475_v53 }
 0x21a   :  { %v3129_v55 = vpop.f32.mrf.mxu1  ;;  %1827 = vmatpush.msra.mxu3 %v1477_v52 }
 0x21d   :  { %1349 = vmatmul.f32.gmra.mxu0 %v948_v9 }
 0x222   :  { %v898_v46 = vpop.f32.mrf.mxu0  ;;  %v3131_v33 = vpop.f32.mrf.mxu1 }
 0x223   :  { %v1137_v10 = vpop.f32.mrf.mxu2  ;;  %v899_v32 = vadd.f32 %v3161_v5, %v898_v46 }
 0x224   :  { %v1211_v61 = vpop.f32.mrf.mxu3 }
 0x225   :  { %v1056_v45 = vadd.f32 %v3129_v55, %v899_v32 }
 0x227   :  { %v1138_v24 = vadd.f32 %v1137_v10, %v1056_v45 }
 0x229   :  { %v1212_v35 = vadd.f32 %v1211_v61, %v1138_v24 }
 0x22a   :  { %v906_v16 = vpop.f32.mrf.mxu0  ;;  %v3136_v20 = vpop.f32.mrf.mxu1 }
 0x22b   :  { %v1142_v15 = vpop.f32.mrf.mxu2  ;;  %v907_v42 = vadd.f32 %v3161_v5, %v906_v16 }
 0x22c   :  { %v1217_v29 = vpop.f32.mrf.mxu3 }
 0x22d   :  { %v1060_v28 = vadd.f32 %v3131_v33, %v907_v42 }
 0x22f   :  { %v1143_v63 = vadd.f32 %v1142_v15, %v1060_v28 }
 0x231   :  { %v1218_v40 = vadd.f32 %v1217_v29, %v1143_v63 }
 0x232   :  { %v914_v12 = vpop.f32.mrf.mxu0  ;;  %v3138_v19 = vpop.f32.mrf.mxu1 }
 0x233   :  { %v1147_v39 = vpop.f32.mrf.mxu2  ;;  %v915_v48 = vadd.f32 %v3161_v5, %v914_v12 }
 0x234   :  { %v1223_v9 = vpop.f32.mrf.mxu3 }
 0x235   :  { %v1064_v49 = vadd.f32 %v3136_v20, %v915_v48 }
 0x237   :  { %v1148_v46 = vadd.f32 %v1147_v39, %v1064_v49 }
 0x239   :  { %v1224_v38 = vadd.f32 %v1223_v9, %v1148_v46 }
 0x23a   :  { %v3143_v31 = vpop.f32.mrf.mxu0  ;;  %v3145_v41 = vpop.f32.mrf.mxu1 }
 0x23b   :  { %v1152_v25 = vpop.f32.mrf.mxu2  ;;  %v923_v33 = vadd.f32 %v3161_v5, %v3143_v31 }
 0x23c   :  { %v1229_v20 = vpop.f32.mrf.mxu3 }
 0x23d   :  { %v1068_v47 = vadd.f32 %v3138_v19, %v923_v33 }
 0x23f   :  { %v1153_v37 = vadd.f32 %v1152_v25, %v1068_v47 }
 0x241   :  { %v1230_v10 = vadd.f32 %v1229_v20, %v1153_v37 }
 0x242   :  { %v3147_v23 = vpop.f32.mrf.mxu0  ;;  %v3149_v44 = vpop.f32.mrf.mxu1 }
 0x243   :  { %v931_v54 = vadd.f32 %v3161_v5, %v3147_v23  ;;  %v1157_v2 = vpop.f32.mrf.mxu2 }
 0x244   :  { %v1235_v61 = vpop.f32.mrf.mxu3 }
 0x245   :  { %v1072_v59 = vadd.f32 %v3145_v41, %v931_v54 }
 0x24a   :  { %v3154_v36 = vpop.f32.mrf.mxu0  ;;  %v3156_v7 = vpop.f32.mrf.mxu1 }
 0x24b   :  { %v939_v29 = vadd.f32 %v3161_v5, %v3154_v36  ;;  %v1162_v28 = vpop.f32.mrf.mxu2 }
 0x252   :  { %v3163_v51 = vpop.f32.mrf.mxu0  ;;  %v3165_v3 = vpop.f32.mrf.mxu1 }
 0x253   :  { %v947_v49 = vadd.f32 %v3161_v5, %v3163_v51  ;;  %v1167_v33 = vpop.f32.mrf.mxu2 }
 0x25a   :  { %v3169_v11 = vpop.f32.mrf.mxu0  ;;  %v1387_v17 = vpop.f32.mrf.mxu1 }
 0x262   :  { %v1322_v8 = vpop.f32.mrf.mxu0  ;;  %v1391_v14 = vpop.f32.mrf.mxu1 }
 0x263   :  { %v1323_v27 = vadd.f32 %v1322_v8, %v1212_v35 }
 0x265   :  { %v1388_v43 = vadd.f32 %v1387_v17, %v1323_v27  ;;  %v1158_v17 = vadd.f32 %v1157_v2, %v1072_v59 }
 0x267   :  { %v1418_v21 = vmax.f32 %v1388_v43, 0.0  ;;  %v1236_v8 = vadd.f32 %v1235_v61, %v1158_v17 }
 0x269   :  { %v1436_v1 = vsel %vm1434_vm0, %v1418_v21, 0  ;;  %v1241_v21 = vpop.f32.mrf.mxu3 }
 0x26a   :  { %v3176_v57 = vand.u32 4294901760, %v1436_v1  ;;  %v1326_v55 = vpop.f32.mrf.mxu0  ;;  %v1395_v50 = vpop.f32.mrf.mxu1 }
 0x26b   :  { %v1327_v26 = vadd.f32 %v1326_v55, %v1218_v40 }
 0x26c   :  { %v1480_v13 = vsub.f32 %v1436_v1, %v3176_v57  ;;  %1581 = vmatmul.f32.vlgmr.msrb.gmra.mxu3 %v3176_v57 }
 0x26d   :  { %v1392_v6 = vadd.f32 %v1391_v14, %v1327_v26  ;;  %v1076_v14 = vadd.f32 %v3149_v44, %v939_v29 }
 0x26e   :  { %v1481_v22 = vand.u32 4294901760, %v1480_v13  ;;  %1639 = vmatmul.f32.vlgmr.msra.gmra.mxu0 %v1480_v13 }
 0x26f   :  { %v1419_v16 = vmax.f32 %v1392_v6, 0.0  ;;  %v1163_v40 = vadd.f32 %v1162_v28, %v1076_v14 }
 0x270   :  { %v1482_v0 = vsub.f32 %v1480_v13, %v1481_v22  ;;  %1701 = vmatmul.f32.vlgmr.msra.gmra.mxu1 %v1481_v22  ;;  %v1080_v13 = vadd.f32 %v3156_v7, %v947_v49 }
 0x271   :  { %v1439_v58 = vsel %vm1434_vm0, %v1419_v16, 0  ;;  %v1242_v25 = vadd.f32 %v1241_v21, %v1163_v40 }
 0x272   :  { %v1483_v12 = vand.u32 4294901760, %v1482_v0  ;;  %v3184_v18 = vand.u32 4294901760, %v1439_v58  ;;  %v1330_v60 = vpop.f32.mrf.mxu0  ;;  %v1399_v30 = vpop.f32.mrf.mxu1  ;;  %v1168_v0 = vadd.f32 %v1167_v33, %v1080_v13 }
 0x273   :  { %v1331_v53 = vadd.f32 %v1330_v60, %v1224_v38  ;;  %v955_v38 = vadd.f32 %v3161_v5, %v3169_v11 }
 0x274   :  { %1484 = vmatmul.f32.vlgmr.msrb.gmra.mxu2 %v1483_v12  ;;  %1585 = vmatmul.f32.gmra.mxu3 %v3184_v18  ;;  %v1488_v31 = vsub.f32 %v1439_v58, %v3184_v18  ;;  %v1247_v58 = vpop.f32.mrf.mxu3 }
 0x275   :  { %v1396_v62 = vadd.f32 %v1395_v50, %v1331_v53  ;;  %v1248_v53 = vadd.f32 %v1247_v58, %v1168_v0 }
 0x276   :  { %1644 = vmatmul.f32.gmra.mxu0 %v1488_v31  ;;  %v1489_v19 = vand.u32 4294901760, %v1488_v31 }
 0x277   :  { %v1420_v52 = vmax.f32 %v1396_v62, 0.0 }
 0x278   :  { %1707 = vmatmul.f32.gmra.mxu1 %v1489_v19  ;;  %v1490_v4 = vsub.f32 %v1488_v31, %v1489_v19 }
 0x279   :  { %v1442_v56 = vsel %vm1434_vm0, %v1420_v52, 0  ;;  %v1172_v52 = vpop.f32.mrf.mxu2 }
 0x27a   :  { %v3192_v34 = vand.u32 4294901760, %v1442_v56  ;;  %v1334_v32 = vpop.f32.mrf.mxu0  ;;  %v1491_v15 = vand.u32 4294901760, %v1490_v4  ;;  %v1403_v42 = vpop.f32.mrf.mxu1 }
 0x27b   :  { %v1335_v45 = vadd.f32 %v1334_v32, %v1230_v10 }
 0x27c   :  { %1492 = vmatmul.f32.gmra.mxu2 %v1491_v15  ;;  %1589 = vmatmul.f32.gmra.mxu3 %v3192_v34  ;;  %v1496_v23 = vsub.f32 %v1442_v56, %v3192_v34  ;;  %v1253_v56 = vpop.f32.mrf.mxu3 }
 0x27d   :  { %v1400_v24 = vadd.f32 %v1399_v30, %v1335_v45  ;;  %v1084_v30 = vadd.f32 %v3165_v3, %v955_v38 }
 0x27e   :  { %1649 = vmatmul.f32.gmra.mxu0 %v1496_v23  ;;  %v1497_v41 = vand.u32 4294901760, %v1496_v23 }
 0x27f   :  { %v1421_v35 = vmax.f32 %v1400_v24, 0.0  ;;  %v1173_v11 = vadd.f32 %v1172_v52, %v1084_v30 }
 0x280   :  { %1713 = vmatmul.f32.gmra.mxu1 %v1497_v41  ;;  %v1498_v39 = vsub.f32 %v1496_v23, %v1497_v41 }
 0x281   :  { %v1445_v27 = vsel %vm1434_vm0, %v1421_v35, 0  ;;  %v1254_v3 = vadd.f32 %v1253_v56, %v1173_v11 }
 0x282   :  { %v3200_v63 = vand.u32 4294901760, %v1445_v27  ;;  %v1338_v48 = vpop.f32.mrf.mxu0  ;;  %v1499_v43 = vand.u32 4294901760, %v1498_v39  ;;  %v1407_v50 = vpop.f32.mrf.mxu1 }
 0x283   :  { %v1339_v9 = vadd.f32 %v1338_v48, %v1236_v8 }
 0x284   :  { %1500 = vmatmul.f32.gmra.mxu2 %v1499_v43  ;;  %1593 = vmatmul.f32.gmra.mxu3 %v3200_v63  ;;  %v1504_v36 = vsub.f32 %v1445_v27, %v3200_v63 }
 0x285   :  { %v1404_v1 = vadd.f32 %v1403_v42, %v1339_v9 }
 0x286   :  { %1654 = vmatmul.f32.gmra.mxu0 %v1504_v36  ;;  %v1505_v44 = vand.u32 4294901760, %v1504_v36 }
 0x287   :  { %v1422_v55 = vmax.f32 %v1404_v1, 0.0 }
 0x288   :  { %1719 = vmatmul.f32.gmra.mxu1 %v1505_v44  ;;  %v1506_v26 = vsub.f32 %v1504_v36, %v1505_v44 }
 0x289   :  { %v1448_v46 = vsel %vm1434_vm0, %v1422_v55, 0 }
 0x28a   :  { %v3208_v6 = vand.u32 4294901760, %v1448_v46  ;;  %v1342_v22 = vpop.f32.mrf.mxu0  ;;  %v1507_v16 = vand.u32 4294901760, %v1506_v26  ;;  %v1411_v54 = vpop.f32.mrf.mxu1 }
 0x28b   :  { %v1343_v20 = vadd.f32 %v1342_v22, %v1242_v25 }
 0x28c   :  { %1508 = vmatmul.f32.gmra.mxu2 %v1507_v16  ;;  %1597 = vmatmul.f32.gmra.mxu3 %v3208_v6  ;;  %v1512_v51 = vsub.f32 %v1448_v46, %v3208_v6  ;;  %v3237_v46 = vld [vmem:[%s3306_s8] ss:$0 sm:$0xff] }
 0x28d   :  { %v1408_v47 = vadd.f32 %v1407_v50, %v1343_v20 }
 0x28e   :  { %1659 = vmatmul.f32.gmra.mxu0 %v1512_v51  ;;  %v1513_v7 = vand.u32 4294901760, %v1512_v51 }
 0x28f   :  { %v1423_v12 = vmax.f32 %v1408_v47, 0.0 }
 0x290   :  { %1725 = vmatmul.f32.gmra.mxu1 %v1513_v7  ;;  %v1514_v60 = vsub.f32 %v1512_v51, %v1513_v7 }
 0x291   :  { %v1451_v31 = vsel %vm1434_vm0, %v1423_v12, 0 }
 0x292   :  { %v1519_v37 = vand.u32 4294901760, %v1451_v31  ;;  %v1346_v62 = vpop.f32.mrf.mxu0  ;;  %v1515_v2 = vand.u32 4294901760, %v1514_v60  ;;  %v1415_v29 = vpop.f32.mrf.mxu1 }
 0x293   :  { %v1347_v19 = vadd.f32 %v1346_v62, %v1248_v53 }
 0x294   :  { %1516 = vmatmul.f32.gmra.mxu2 %v1515_v2  ;;  %1601 = vmatmul.f32.gmra.mxu3 %v1519_v37  ;;  %v1520_v5 = vsub.f32 %v1451_v31, %v1519_v37 }
 0x295   :  { %v1412_v4 = vadd.f32 %v1411_v54, %v1347_v19 }
 0x296   :  { %1664 = vmatmul.f32.gmra.mxu0 %v1520_v5  ;;  %v1521_v10 = vand.u32 4294901760, %v1520_v5 }
 0x297   :  { %v1424_v59 = vmax.f32 %v1412_v4, 0.0 }
 0x298   :  { %1731 = vmatmul.f32.gmra.mxu1 %v1521_v10  ;;  %v1522_v61 = vsub.f32 %v1520_v5, %v1521_v10 }
 0x299   :  { %v1454_v32 = vsel %vm1434_vm0, %v1424_v59, 0 }
 0x29a   :  { %v1527_v15 = vand.u32 4294901760, %v1454_v32  ;;  %v1350_v45 = vpop.f32.mrf.mxu0  ;;  %v1523_v23 = vand.u32 4294901760, %v1522_v61 }
 0x29b   :  { %v1351_v17 = vadd.f32 %v1350_v45, %v1254_v3 }
 0x29c   :  { %1524 = vmatmul.f32.gmra.mxu2 %v1523_v23  ;;  %1605 = vmatmul.f32.gmra.mxu3 %v1527_v15  ;;  %v1528_v24 = vsub.f32 %v1454_v32, %v1527_v15 }
 0x29d   :  { %v1416_v42 = vadd.f32 %v1415_v29, %v1351_v17 }
 0x29e   :  { %1669 = vmatmul.f32.gmra.mxu0 %v1528_v24  ;;  %v1529_v41 = vand.u32 4294901760, %v1528_v24 }
 0x29f   :  { %v1425_v35 = vmax.f32 %v1416_v42, 0.0 }
 0x2a0   :  { %1737 = vmatmul.f32.gmra.mxu1 %v1529_v41  ;;  %v1530_v28 = vsub.f32 %v1528_v24, %v1529_v41 }
 0x2a1   :  { %v1457_v39 = vsel %vm1434_vm0, %v1425_v35, 0 }
 0x2a2   :  { %v1535_v8 = vand.u32 4294901760, %v1457_v39  ;;  %v1531_v14 = vand.u32 4294901760, %v1530_v28 }
 0x2a4   :  { %1532 = vmatmul.f32.gmra.mxu2 %v1531_v14  ;;  %1609 = vmatmul.f32.gmra.mxu3 %v1535_v8  ;;  %v1536_v27 = vsub.f32 %v1457_v39, %v1535_v8 }
 0x2a6   :  { %1674 = vmatmul.f32.gmra.mxu0 %v1536_v27  ;;  %v1537_v48 = vand.u32 4294901760, %v1536_v27 }
 0x2a8   :  { %1743 = vmatmul.f32.gmra.mxu1 %v1537_v48  ;;  %v1538_v43 = vsub.f32 %v1536_v27, %v1537_v48 }
 0x2aa   :  { %v1539_v9 = vand.u32 4294901760, %v1538_v43 }
 0x2ac   :  { %1540 = vmatmul.f32.gmra.mxu2 %v1539_v9  ;;  %1829 = vmatmul.f32.vlgmr.msra.gmra.mxu3 %v3176_v57 }
 0x2b4   :  { %1776 = vmatmul.f32.vlgmr.msra.gmra.mxu2 %v3176_v57  ;;  %1833 = vmatmul.f32.gmra.mxu3 %v3184_v18 }
 0x2bc   :  { %1780 = vmatmul.f32.gmra.mxu2 %v3184_v18  ;;  %1837 = vmatmul.f32.gmra.mxu3 %v3192_v34 }
 0x2c4   :  { %1784 = vmatmul.f32.gmra.mxu2 %v3192_v34  ;;  %1841 = vmatmul.f32.gmra.mxu3 %v3200_v63 }
 0x2cc   :  { %1788 = vmatmul.f32.gmra.mxu2 %v3200_v63  ;;  %1845 = vmatmul.f32.gmra.mxu3 %v3208_v6 }
 0x2d4   :  { %1792 = vmatmul.f32.gmra.mxu2 %v3208_v6  ;;  %1849 = vmatmul.f32.gmra.mxu3 %v1519_v37 }
 0x2dc   :  { %1796 = vmatmul.f32.gmra.mxu2 %v1519_v37  ;;  %1853 = vmatmul.f32.gmra.mxu3 %v1527_v15 }
 0x2e4   :  { %1800 = vmatmul.f32.gmra.mxu2 %v1527_v15  ;;  %1857 = vmatmul.f32.gmra.mxu3 %v1535_v8 }
 0x2eb   :  { %v1640_v25 = vpop.f32.mrf.mxu0 }
 0x2ec   :  { %1804 = vmatmul.f32.gmra.mxu2 %v1535_v8 }
 0x2ed   :  { %v1702_v13 = vpop.f32.mrf.mxu1 }
 0x2ef   :  { %v1582_v57 = vpop.f32.mrf.mxu3 }
 0x2f3   :  { %v1645_v16 = vpop.f32.mrf.mxu0 }
 0x2f5   :  { %v1708_v38 = vpop.f32.mrf.mxu1 }
 0x2f7   :  { %v1485_v18 = vpop.f32.mrf.mxu2  ;;  %v1586_v21 = vpop.f32.mrf.mxu3 }
 0x2f8   :  { %v1486_v22 = vadd.f32 %v3237_v46, %v1485_v18 }
 0x2fa   :  { %v1583_v20 = vadd.f32 %v1582_v57, %v1486_v22 }
 0x2fb   :  { %v1650_v7 = vpop.f32.mrf.mxu0 }
 0x2fc   :  { %v1641_v58 = vadd.f32 %v1640_v25, %v1583_v20 }
 0x2fd   :  { %v1714_v2 = vpop.f32.mrf.mxu1 }
 0x2fe   :  { %v1703_v60 = vadd.f32 %v1702_v13, %v1641_v58 }
 0x2ff   :  { %v1493_v36 = vpop.f32.mrf.mxu2  ;;  %v1590_v40 = vpop.f32.mrf.mxu3 }
 0x300   :  { %v1494_v47 = vadd.f32 %v3237_v46, %v1493_v36 }
 0x302   :  { %v1587_v12 = vadd.f32 %v1586_v21, %v1494_v47 }
 0x303   :  { %v1655_v56 = vpop.f32.mrf.mxu0 }
 0x304   :  { %v1646_v62 = vadd.f32 %v1645_v16, %v1587_v12 }
 0x305   :  { %v1720_v45 = vpop.f32.mrf.mxu1 }
 0x306   :  { %v1709_v11 = vadd.f32 %v1708_v38, %v1646_v62 }
 0x307   :  { %v1501_v34 = vpop.f32.mrf.mxu2  ;;  %v1594_v49 = vpop.f32.mrf.mxu3 }
 0x308   :  { %v1502_v37 = vadd.f32 %v3237_v46, %v1501_v34 }
 0x30a   :  { %v1591_v52 = vadd.f32 %v1590_v40, %v1502_v37 }
 0x30b   :  { %v1660_v27 = vpop.f32.mrf.mxu0 }
 0x30c   :  { %v1651_v32 = vadd.f32 %v1650_v7, %v1591_v52 }
 0x30d   :  { %v1726_v36 = vpop.f32.mrf.mxu1 }
 0x30e   :  { %v1715_v24 = vadd.f32 %v1714_v2, %v1651_v32 }
 0x30f   :  { %v1509_v1 = vpop.f32.mrf.mxu2  ;;  %v1598_v44 = vpop.f32.mrf.mxu3 }
 0x310   :  { %v1510_v61 = vadd.f32 %v3237_v46, %v1509_v1 }
 0x312   :  { %v1595_v17 = vadd.f32 %v1594_v49, %v1510_v61 }
 0x313   :  { %v1665_v47 = vpop.f32.mrf.mxu0 }
 0x314   :  { %v1656_v14 = vadd.f32 %v1655_v56, %v1595_v17 }
 0x315   :  { %v1732_v2 = vpop.f32.mrf.mxu1 }
 0x316   :  { %v1721_v18 = vadd.f32 %v1720_v45, %v1656_v14 }
 0x317   :  { %v1517_v63 = vpop.f32.mrf.mxu2  ;;  %v3228_v55 = vpop.f32.mrf.mxu3 }
 0x318   :  { %v1518_v39 = vadd.f32 %v3237_v46, %v1517_v63 }
 0x31a   :  { %v1599_v9 = vadd.f32 %v1598_v44, %v1518_v39 }
 0x31c   :  { %v1661_v22 = vadd.f32 %v1660_v27, %v1599_v9 }
 0x31d   :  { %v1738_v27 = vpop.f32.mrf.mxu1 }
 0x31f   :  { %v3230_v50 = vpop.f32.mrf.mxu2  ;;  %v3232_v26 = vpop.f32.mrf.mxu3 }
 0x320   :  { %v1526_v63 = vadd.f32 %v3237_v46, %v3230_v50 }
 0x327   :  { %v3239_v33 = vpop.f32.mrf.mxu2  ;;  %v3241_v6 = vpop.f32.mrf.mxu3 }
 0x32f   :  { %v3244_v51 = vpop.f32.mrf.mxu2  ;;  %v1830_v0 = vpop.f32.mrf.mxu3 }
 0x337   :  { %v1777_v53 = vpop.f32.mrf.mxu2  ;;  %v1834_v30 = vpop.f32.mrf.mxu3 }
 0x338   :  { %v1778_v31 = vadd.f32 %v1777_v53, %v1703_v60  ;;  %v1727_v60 = vadd.f32 %v1726_v36, %v1661_v22 }
 0x33a   :  { %v1831_v54 = vadd.f32 %v1830_v0, %v1778_v31 }
 0x33c   :  { %v1861_v19 = vsub.f32 0.0, %v1831_v54 }
 0x33e   :  { %v1869_v5 = vmul.f32 1.442695, %v1861_v19 }
 0x33f   :  { %v1781_v4 = vpop.f32.mrf.mxu2  ;;  %v1838_v10 = vpop.f32.mrf.mxu3 }
 0x340   :  { %2098 = vpow2.f32 %v1869_v5  ;;  %v1782_v59 = vadd.f32 %v1781_v4, %v1709_v11  ;;  %v1534_v5 = vadd.f32 %v3237_v46, %v3239_v33 }
 0x342   :  { %v1835_v3 = vadd.f32 %v1834_v30, %v1782_v59  ;;  %v1603_v30 = vadd.f32 %v3228_v55, %v1526_v63  ;;  %v1607_v17 = vadd.f32 %v3232_v26, %v1534_v5 }
 0x344   :  { %v1862_v15 = vsub.f32 0.0, %v1835_v3  ;;  %v1666_v4 = vadd.f32 %v1665_v47, %v1603_v30 }
 0x346   :  { %v2099_v23 = vpop.eup %2098  ;;  %v1871_v29 = vmul.f32 1.442695, %v1862_v15 }
 0x347   :  { %v1885_v42 = vadd.f32 1.0, %v2099_v23  ;;  %v1785_v41 = vpop.f32.mrf.mxu2  ;;  %v1842_v28 = vpop.f32.mrf.mxu3 }
 0x348   :  { %2100 = vpow2.f32 %v1871_v29  ;;  %v1786_v35 = vadd.f32 %v1785_v41, %v1715_v24  ;;  %v1670_v23 = vpop.f32.mrf.mxu0 }
 0x349   :  { %2102 = vrcp.f32 %v1885_v42  ;;  %v1904_v16 = vand.u32 2147483648, %v1885_v42  ;;  %v1902_v44 = vand.u32 2147483647, %v1885_v42  ;;  %vm1898_vm2 = vweird.f32 %v1885_v42 }
 0x34a   :  { %v1839_v8 = vadd.f32 %v1838_v10, %v1786_v35 }
 0x34b   :  { %v1905_v31 = vor.u32 1.1754944e-38, %v1904_v16  ;;  %vm1903_vm5 = vcmp.eq.f32.partialorder %v1902_v44, 8.507059e+37 }
 0x34c   :  { %v1863_v48 = vsub.f32 0.0, %v1839_v8  ;;  %v1542_v8 = vadd.f32 %v3237_v46, %v3244_v51 }
 0x34e   :  { %v2101_v43 = vpop.eup %2100  ;;  %v1873_v57 = vmul.f32 1.442695, %v1863_v48 }
 0x34f   :  { %v2103_v21 = vpop.eup %2102  ;;  %v1886_v40 = vadd.f32 1.0, %v2101_v43  ;;  %v1789_v34 = vpop.f32.mrf.mxu2  ;;  %v1671_v43 = vadd.f32 %v1670_v23, %v1607_v17 }
 0x350   :  { %v1894_v49 = vmul.f32 %v2103_v21, %v1885_v42  ;;  %2104 = vpow2.f32 %v1873_v57  ;;  %v1790_v1 = vadd.f32 %v1789_v34, %v1721_v18  ;;  %v1846_v20 = vpop.f32.mrf.mxu3  ;;  %vm1899_vm1 = vweird.f32 %v2103_v21  ;;  %v1675_v16 = vpop.f32.mrf.mxu0 }
 0x351   :  { %2106 = vrcp.f32 %v1886_v40  ;;  %vm1900_vm3 = vmor %vm1898_vm2, %vm1899_vm1  ;;  %v1918_v11 = vand.u32 2147483648, %v1886_v40  ;;  %v1916_v59 = vand.u32 2147483647, %v1886_v40  ;;  %vm1912_vm7 = vweird.f32 %v1886_v40 }
 0x352   :  { %v1895_v25 = vsub.f32 1.0, %v1894_v49  ;;  %v1843_v13 = vadd.f32 %v1842_v28, %v1790_v1  ;;  %v1733_v42 = vadd.f32 %v1732_v2, %v1666_v4  ;;  %v1739_v49 = vadd.f32 %v1738_v27, %v1671_v43 }
 0x353   :  { %v1919_v29 = vor.u32 1.1754944e-38, %v1918_v11  ;;  %vm1917_vm9 = vcmp.eq.f32.partialorder %v1916_v59, 8.507059e+37 }
 0x354   :  { %v1896_v0 = vmul.f32 %v2103_v21, %v1895_v25  ;;  %v1864_v38 = vsub.f32 0.0, %v1843_v13 }
 0x356   :  { %v2105_v58 = vpop.eup %2104  ;;  %v1897_v7 = vadd.f32 %v2103_v21, %v1896_v0  ;;  %v1875_v12 = vmul.f32 1.442695, %v1864_v38 }
 0x357   :  { %v2107_v53 = vpop.eup %2106  ;;  %v3253_v37 = vadd.f32 1.0, %v2105_v58  ;;  %v1793_v50 = vpop.f32.mrf.mxu2 }
 0x358   :  { %v1901_v54 = vsel %vm1900_vm3, %v2103_v21, %v1897_v7  ;;  %v1908_v62 = vmul.f32 %v2107_v53, %v1886_v40  ;;  %2108 = vpow2.f32 %v1875_v12  ;;  %v1794_v52 = vadd.f32 %v1793_v50, %v1727_v60  ;;  %v1850_v61 = vpop.f32.mrf.mxu3  ;;  %v1744_v60 = vpop.f32.mrf.mxu1 }
 0x359   :  { %v1906_v19 = vsel %vm1903_vm5, %v1905_v31, %v1901_v54  ;;  %2110 = vrcp.f32 %v3253_v37  ;;  %vm1913_vm6 = vweird.f32 %v2107_v53  ;;  %v1932_v48 = vand.u32 2147483648, %v3253_v37 }
 0x35a   :  { %2006 = vst.msk [vmem:[%s3307_s9] sm:$0xff] %vm2005_vm4, %v1906_v19  ;;  %v1909_v55 = vsub.f32 1.0, %v1908_v62  ;;  %v1847_v56 = vadd.f32 %v1846_v20, %v1794_v52  ;;  %vm1914_vm8 = vmor %vm1912_vm7, %vm1913_vm6  ;;  %v1930_v57 = vand.u32 2147483647, %v3253_v37  ;;  %v1611_v21 = vadd.f32 %v3241_v6, %v1542_v8 }
 0x35b   :  { %vm1926_vm11 = vweird.f32 %v3253_v37  ;;  %v1933_v40 = vor.u32 1.1754944e-38, %v1932_v48 }
 0x35c   :  { %v1910_v10 = vmul.f32 %v2107_v53, %v1909_v55  ;;  %v1865_v15 = vsub.f32 0.0, %v1847_v56  ;;  %vm1931_vm13 = vcmp.eq.f32.partialorder %v1930_v57, 8.507059e+37  ;;  %v1676_v38 = vadd.f32 %v1675_v16, %v1611_v21 }
 0x35e   :  { %v2109_v3 = vpop.eup %2108  ;;  %v1911_v32 = vadd.f32 %v2107_v53, %v1910_v10  ;;  %v1877_v28 = vmul.f32 1.442695, %v1865_v15  ;;  %v1745_v31 = vadd.f32 %v1744_v60, %v1676_v38 }
 0x35f   :  { %v2111_v45 = vpop.eup %2110  ;;  %v1888_v24 = vadd.f32 1.0, %v2109_v3  ;;  %v1797_v33 = vpop.f32.mrf.mxu2 }
 0x360   :  { %v1915_v41 = vsel %vm1914_vm8, %v2107_v53, %v1911_v32  ;;  %v1922_v35 = vmul.f32 %v2111_v45, %v3253_v37  ;;  %v1798_v14 = vadd.f32 %v1797_v33, %v1733_v42  ;;  %vm1927_vm10 = vweird.f32 %v2111_v45  ;;  %v1854_v34 = vpop.f32.mrf.mxu3 }
 0x361   :  { %v1920_v39 = vsel %vm1917_vm9, %v1919_v29, %v1915_v41  ;;  %2112 = vrcp.f32 %v1888_v24  ;;  %vm1928_vm12 = vmor %vm1926_vm11, %vm1927_vm10  ;;  %v1946_v47 = vand.u32 2147483648, %v1888_v24  ;;  %v1944_v7 = vand.u32 2147483647, %v1888_v24 }
 0x362   :  { %2007 = vst.msk [vmem:[%s3307_s9 + $0x8] sm:$0xff] %vm2005_vm4, %v1920_v39  ;;  %v1923_v26 = vsub.f32 1.0, %v1922_v35  ;;  %2114 = vpow2.f32 %v1877_v28  ;;  %v1851_v18 = vadd.f32 %v1850_v61, %v1798_v14  ;;  %vm1940_vm15 = vweird.f32 %v1888_v24 }
 0x363   :  { %v1947_v37 = vor.u32 1.1754944e-38, %v1946_v47  ;;  %vm1945_vm1 = vcmp.eq.f32.partialorder %v1944_v7, 8.507059e+37 }
 0x364   :  { %v1924_v9 = vmul.f32 %v2111_v45, %v1923_v26  ;;  %v1866_v51 = vsub.f32 0.0, %v1851_v18 }
 0x366   :  { %v1925_v46 = vadd.f32 %v2111_v45, %v1924_v9  ;;  %v1879_v63 = vmul.f32 1.442695, %v1866_v51 }
 0x367   :  { %v2113_v36 = vpop.eup %2112  ;;  %v1801_v1 = vpop.f32.mrf.mxu2 }
 0x368   :  { %v2115_v25 = vpop.eup %2114  ;;  %v1929_v13 = vsel %vm1928_vm12, %v2111_v45, %v1925_v46  ;;  %v1936_v22 = vmul.f32 %v2113_v36, %v1888_v24  ;;  %v1802_v44 = vadd.f32 %v1801_v1, %v1739_v49  ;;  %2116 = vpow2.f32 %v1879_v63  ;;  %v1858_v11 = vpop.f32.mrf.mxu3 }
 0x369   :  { %v1934_v20 = vsel %vm1931_vm13, %v1933_v40, %v1929_v13  ;;  %v1889_v0 = vadd.f32 1.0, %v2115_v25  ;;  %vm1941_vm14 = vweird.f32 %v2113_v36 }
 0x36a   :  { %2008 = vst.msk [vmem:[%s3307_s9 + $0x10] sm:$0xff] %vm2005_vm4, %v1934_v20  ;;  %v1937_v6 = vsub.f32 1.0, %v1936_v22  ;;  %v1855_v12 = vadd.f32 %v1854_v34, %v1802_v44  ;;  %vm1942_vm0 = vmor %vm1940_vm15, %vm1941_vm14 }
 0x36b   :  { %2118 = vrcp.f32 %v1889_v0  ;;  %v1960_v61 = vand.u32 2147483648, %v1889_v0  ;;  %v1958_v32 = vand.u32 2147483647, %v1889_v0  ;;  %vm1954_vm3 = vweird.f32 %v1889_v0 }
 0x36c   :  { %v1938_v58 = vmul.f32 %v2113_v36, %v1937_v6  ;;  %v1867_v30 = vsub.f32 0.0, %v1855_v12 }
 0x36d   :  { %v1961_v29 = vor.u32 1.1754944e-38, %v1960_v61  ;;  %vm1959_vm6 = vcmp.eq.f32.partialorder %v1958_v32, 8.507059e+37 }
 0x36e   :  { %v1939_v53 = vadd.f32 %v2113_v36, %v1938_v58  ;;  %v2117_v54 = vpop.eup %2116  ;;  %v1881_v2 = vmul.f32 1.442695, %v1867_v30 }
 0x36f   :  { %v1805_v50 = vpop.f32.mrf.mxu2  ;;  %v1890_v5 = vadd.f32 1.0, %v2117_v54 }
 0x370   :  { %v1943_v62 = vsel %vm1942_vm0, %v2113_v36, %v1939_v53  ;;  %v1806_v19 = vadd.f32 %v1805_v50, %v1745_v31  ;;  %2120 = vpow2.f32 %v1881_v2 }
 0x371   :  { %v2119_v55 = vpop.eup %2118  ;;  %v1948_v52 = vsel %vm1945_vm1, %v1947_v37, %v1943_v62  ;;  %2122 = vrcp.f32 %v1890_v5  ;;  %v1974_v28 = vand.u32 2147483648, %v1890_v5  ;;  %v1972_v26 = vand.u32 2147483647, %v1890_v5 }
 0x372   :  { %2009 = vst.msk [vmem:[%s3307_s9 + $0x18] sm:$0xff] %vm2005_vm4, %v1948_v52  ;;  %v1950_v4 = vmul.f32 %v2119_v55, %v1889_v0  ;;  %v1859_v10 = vadd.f32 %v1858_v11, %v1806_v19  ;;  %vm1955_vm2 = vweird.f32 %v2119_v55  ;;  %vm1968_vm8 = vweird.f32 %v1890_v5 }
 0x373   :  { %vm1956_vm5 = vmor %vm1954_vm3, %vm1955_vm2  ;;  %v1975_v43 = vor.u32 1.1754944e-38, %v1974_v28  ;;  %vm1973_vm10 = vcmp.eq.f32.partialorder %v1972_v26, 8.507059e+37 }
 0x374   :  { %v1951_v59 = vsub.f32 1.0, %v1950_v4  ;;  %v1868_v56 = vsub.f32 0.0, %v1859_v10 }
 0x376   :  { %v1952_v3 = vmul.f32 %v2119_v55, %v1951_v59  ;;  %v1883_v15 = vmul.f32 1.442695, %v1868_v56  ;;  %v2121_v45 = vpop.eup %2120 }
 0x377   :  { %v2123_v17 = vpop.eup %2122  ;;  %v1891_v24 = vadd.f32 1.0, %v2121_v45 }
 0x378   :  { %v1953_v23 = vadd.f32 %v2119_v55, %v1952_v3  ;;  %2124 = vpow2.f32 %v1883_v15  ;;  %v1964_v33 = vmul.f32 %v2123_v17, %v1890_v5  ;;  %vm1969_vm7 = vweird.f32 %v2123_v17 }
 0x379   :  { %2126 = vrcp.f32 %v1891_v24  ;;  %vm1970_vm9 = vmor %vm1968_vm8, %vm1969_vm7  ;;  %v1988_v46 = vand.u32 2147483648, %v1891_v24  ;;  %v1986_v36 = vand.u32 2147483647, %v1891_v24  ;;  %vm1982_vm12 = vweird.f32 %v1891_v24 }
 0x37a   :  { %v1957_v42 = vsel %vm1956_vm5, %v2119_v55, %v1953_v23  ;;  %v1965_v35 = vsub.f32 1.0, %v1964_v33 }
 0x37b   :  { %v1962_v41 = vsel %vm1959_vm6, %v1961_v29, %v1957_v42  ;;  %v1989_v1 = vor.u32 1.1754944e-38, %v1988_v46  ;;  %vm1987_vm14 = vcmp.eq.f32.partialorder %v1986_v36, 8.507059e+37 }
 0x37c   :  { %2010 = vst.msk [vmem:[%s3307_s9 + $0x20] sm:$0xff] %vm2005_vm4, %v1962_v41  ;;  %v1966_v8 = vmul.f32 %v2123_v17, %v1965_v35 }
 0x37e   :  { %v2125_v39 = vpop.eup %2124  ;;  %v1967_v27 = vadd.f32 %v2123_v17, %v1966_v8 }
 0x37f   :  { %v1892_v14 = vadd.f32 1.0, %v2125_v39  ;;  %v2127_v48 = vpop.eup %2126 }
 0x380   :  { %v1971_v9 = vsel %vm1970_vm9, %v2123_v17, %v1967_v27  ;;  %v1978_v57 = vmul.f32 %v2127_v48, %v1891_v24  ;;  %vm1983_vm11 = vweird.f32 %v2127_v48 }
 0x381   :  { %2128 = vrcp.f32 %v1892_v14  ;;  %v1976_v18 = vsel %vm1973_vm10, %v1975_v43, %v1971_v9  ;;  %vm1984_vm13 = vmor %vm1982_vm12, %vm1983_vm11  ;;  %v2002_v63 = vand.u32 2147483648, %v1892_v14  ;;  %v2000_v20 = vand.u32 2147483647, %v1892_v14 }
 0x382   :  { %2011 = vst.msk [vmem:[%s3307_s9 + $0x28] sm:$0xff] %vm2005_vm4, %v1976_v18  ;;  %v1979_v21 = vsub.f32 1.0, %v1978_v57  ;;  %vm1996_vm0 = vweird.f32 %v1892_v14 }
 0x383   :  { %v2003_v44 = vor.u32 1.1754944e-38, %v2002_v63  ;;  %vm2001_vm2 = vcmp.eq.f32.partialorder %v2000_v20, 8.507059e+37 }
 0x384   :  { %v1980_v51 = vmul.f32 %v2127_v48, %v1979_v21 }
 0x386   :  { %v1981_v34 = vadd.f32 %v2127_v48, %v1980_v51 }
 0x387   :  { %v2129_v40 = vpop.eup %2128 }
 0x388   :  { %v1992_v49 = vmul.f32 %v2129_v40, %v1892_v14  ;;  %v1985_v25 = vsel %vm1984_vm13, %v2127_v48, %v1981_v34  ;;  %vm1997_vm15 = vweird.f32 %v2129_v40 }
 0x389   :  { %v1990_v22 = vsel %vm1987_vm14, %v1989_v1, %v1985_v25  ;;  %vm1998_vm1 = vmor %vm1996_vm0, %vm1997_vm15 }
 0x38a   :  { %v1993_v13 = vsub.f32 1.0, %v1992_v49  ;;  %2012 = vst.msk [vmem:[%s3307_s9 + $0x30] sm:$0xff] %vm2005_vm4, %v1990_v22 }
 0x38c   :  { %v1994_v16 = vmul.f32 %v2129_v40, %v1993_v13 }
 0x38e   :  { %v1995_v0 = vadd.f32 %v2129_v40, %v1994_v16 }
 0x390   :  { %v1999_v6 = vsel %vm1998_vm1, %v2129_v40, %v1995_v0 }
 0x391   :  { %v2004_v38 = vsel %vm2001_vm2, %v2003_v44, %v1999_v6 }
 0x392   :  { %2013 = vst.msk [vmem:[%s3307_s9 + $0x38] sm:$0xff] %vm2005_vm4, %v2004_v38 }
 0x393   :  { %2018 = vsyncpa [#allocation3], 1 }

</bundles_post_ra>
